<compile_context>
chip_gen: v6e
topology: v6e:2x2x1
jax: 0.10.0
libtpu: 0.0.40
codegen_flags: <defaults>
</compile_context>

<pallas_src>
import functools

import jax
import jax.numpy as jnp
from jax.experimental import pallas as pl
from jax.experimental.pallas import tpu as pltpu

HIDDEN = 256          # hidden_channel
HALF = HIDDEN // 2    # 128
W_CH = 16             # w_channel
IN_CH = 3             # in_channel (pts)
IN_PACK = 32          # pts(3) + w(16), zero-padded to 32 lanes
OUT_FEAT = 64         # out_channel
OUT_SIGMA = 1         # out_channel_s
OUT_PACK = 128        # feat(64) + sigma(1 @ lane 64) + 0-pad -> 128 lanes


def _round_up(x, m):
    return (x + m - 1) // m * m


def _leaky_relu(x, slope=0.2):
    # maximum form: 2 VPU ops (mul + max), no compare/select.
    return jnp.maximum(x, slope * x)


def _stuff_decoder_kernel(
    x_ref,                    # (T, 32)   bf16 : [pts | w | 0-pad]
    win_ref, bin_ref,         # (32, 256) bf16, (1, 256) bf16   fused fc_pts/fc_z
    wm0_ref, bm0_ref,         # (256, 256) bf16, (1, 256) bf16  fc_main[0]
    wm1_ref, bm1_ref,         # (256, 256) bf16, (1, 256) bf16  fc_main[1]
    ws_ref, bs_ref,           # (1, 256) f32, (1, 1) f32        fc_sigma (VPU path)
    wf_ref, bf_ref,           # (256, 128) bf16, (1, 128) bf16  fc_feat (lane-padded)
    out_ref,                  # (T, 128)  bf16 : [feat | sigma | 0-pad]
):
    # Fused fc_pts / fc_z (block-diagonal weight); MXU f32 accumulate, then the
    # bias-add + activation chain stays in bf16.
    h = jnp.dot(x_ref[...], win_ref[...], preferred_element_type=jnp.float32)
    f = _leaky_relu(h.astype(jnp.bfloat16) + bin_ref[...])

    # fc_main[0] + LeakyReLU   (i + 2 == n_block_num at i == 0 -> sigma branch)
    h = jnp.dot(f, wm0_ref[...], preferred_element_type=jnp.float32)
    f0 = _leaky_relu(h.astype(jnp.bfloat16) + bm0_ref[...])

    # fc_sigma on the VPU in f32 (an N=1 matmul would waste a full MXU pass).
    sigma = (jnp.sum(f0.astype(jnp.float32) * ws_ref[...], axis=-1,
                     keepdims=True) + bs_ref[...])

    # fc_main[1] + LeakyReLU
    h = jnp.dot(f0, wm1_ref[...], preferred_element_type=jnp.float32)
    f1 = _leaky_relu(h.astype(jnp.bfloat16) + bm1_ref[...])

    # fc_feat padded to 128 output lanes (cols 64..127 zero) + tanh.
    h = jnp.dot(f1, wf_ref[...], preferred_element_type=jnp.float32)
    feat128 = jnp.tanh(h.astype(jnp.bfloat16) + bf_ref[...])

    # Insert sigma at lane OUT_FEAT with one select; single unmasked 128-wide store.
    lane = jax.lax.broadcasted_iota(jnp.int32, feat128.shape, 1)
    out_ref[...] = jnp.where(lane == OUT_FEAT, sigma.astype(jnp.bfloat16), feat128)


def init_params(key):
    """Deterministic synthetic parameters (shapes match the torch module)."""
    ks = jax.random.split(key, 6)

    def lin(k, fan_in, fan_out):
        # uniform(-1/sqrt(fan_in), 1/sqrt(fan_in)), like torch default init
        bound = 1.0 / jnp.sqrt(fan_in)
        kw, kb = jax.random.split(k)
        w = jax.random.uniform(kw, (fan_in, fan_out), jnp.float32, -bound, bound)
        b = jax.random.uniform(kb, (1, fan_out), jnp.float32, -bound, bound)
        return w, b

    wp, bp = lin(ks[0], IN_CH, HALF)        # fc_pts
    wz, bz = lin(ks[1], W_CH, HALF)         # fc_z
    wm0, bm0 = lin(ks[2], HIDDEN, HIDDEN)   # fc_main[0]
    wm1, bm1 = lin(ks[3], HIDDEN, HIDDEN)   # fc_main[1]
    ws, bs = lin(ks[4], HIDDEN, OUT_SIGMA)  # fc_sigma
    wf, bf = lin(ks[5], HIDDEN, OUT_FEAT)   # fc_feat
    return dict(wp=wp, bp=bp, wz=wz, bz=bz, wm0=wm0, bm0=bm0,
                wm1=wm1, bm1=bm1, ws=ws, bs=bs, wf=wf, bf=bf)


def pack_params(params):
    """Build the kernel-side parameter set (bf16 MXU weights, fused front-end)."""
    # Block-diagonal fused weight for fc_pts (rows 0:3 -> cols 0:128) and
    # fc_z (rows 3:19 -> cols 128:256); padding rows are zero.
    w_in = jnp.zeros((IN_PACK, HIDDEN), jnp.float32)
    w_in = w_in.at[:IN_CH, :HALF].set(params["wp"])
    w_in = w_in.at[IN_CH:IN_CH + W_CH, HALF:].set(params["wz"])
    b_in = jnp.concatenate([params["bp"], params["bz"]], axis=-1)   # (1, 256)

    # fc_feat padded to 128 output lanes (cols 64..127 zero weight & bias) so
    # the kernel's last matmul directly produces the packed output slab.
    wf = jnp.zeros((HIDDEN, OUT_PACK), jnp.float32).at[:, :OUT_FEAT].set(params["wf"])
    bf = jnp.zeros((1, OUT_PACK), jnp.float32).at[:, :OUT_FEAT].set(params["bf"])

    bf16 = jnp.bfloat16
    return dict(
        w_in=w_in.astype(bf16), b_in=b_in.astype(bf16),
        wm0=params["wm0"].astype(bf16), bm0=params["bm0"].astype(bf16),
        wm1=params["wm1"].astype(bf16), bm1=params["bm1"].astype(bf16),
        ws_row=params["ws"].T,                  # (1, 256) f32, VPU reduction
        bs=params["bs"],                        # (1, 1)  f32
        wf=wf.astype(bf16), bf=bf.astype(bf16),
    )


@functools.partial(jax.jit, static_argnames=("tile",))
def stuff_decoder_forward(w, pts, kparams, *, tile=2048):
    """w: (P, 16) projected features; pts: (P, >=3) point coords.

    `tile` is the row tile; sweep 1024-4096 (up to 8192 on v5e/v6e's 128 MiB VMEM).
    """
    p_num = w.shape[0]
    pts = pts[..., :IN_CH]

    # Effective tile: multiple of 128, never larger than the padded point count,
    # and capped so the grid has >= 2 steps whenever p_pad >= 256 (lets the
    # "parallel" axis shard across both v7x TensorCores).
    p_pad128 = _round_up(p_num, 128)
    tile_eff = min(_round_up(tile, 128),
                   max(128, _round_up(p_pad128 // 2, 128)))
    p_pad = _round_up(p_num, tile_eff)
    grid = (p_pad // tile_eff,)

    # Pack [pts | w | zero-pad] into one lane-aligned bf16 input stream with a
    # single concatenate + pad (no f32 zeros buffer / scatter round trip).
    # TODO(synk): pts/w are quantized to bf16 before the first matmul (~0.4%
    # rel. error); keep the K=32 front-end matmul in f32 if world coordinates
    # are large/offset.
    x = jnp.concatenate([pts.astype(jnp.bfloat16), w.astype(jnp.bfloat16)],
                        axis=-1)
    x = jnp.pad(x, ((0, p_pad - p_num), (0, IN_PACK - (IN_CH + W_CH))))

    full = lambda shape: pl.BlockSpec(shape, lambda i: (0, 0))

    grid_spec = pltpu.PrefetchScalarGridSpec(
        num_scalar_prefetch=0,
        grid=grid,
        in_specs=[
            pl.BlockSpec((tile_eff, IN_PACK), lambda i: (i, 0)),   # packed input
            full((IN_PACK, HIDDEN)), full((1, HIDDEN)),            # fused fc_pts/fc_z
            full((HIDDEN, HIDDEN)), full((1, HIDDEN)),             # fc_main[0]
            full((HIDDEN, HIDDEN)), full((1, HIDDEN)),             # fc_main[1]
            full((1, HIDDEN)), full((1, 1)),                       # fc_sigma (row + bias)
            full((HIDDEN, OUT_PACK)), full((1, OUT_PACK)),         # fc_feat (lane-padded)
        ],
        out_specs=pl.BlockSpec((tile_eff, OUT_PACK), lambda i: (i, 0)),
    )

    flops = 2 * p_pad * (IN_PACK * HIDDEN + 2 * HIDDEN * HIDDEN
                         + HIDDEN * OUT_PACK + HIDDEN)
    bytes_accessed = (p_pad * IN_PACK * 2 + p_pad * OUT_PACK * 2
                      + (IN_PACK * HIDDEN + 2 * HIDDEN * HIDDEN
                         + HIDDEN * OUT_PACK + 4 * HIDDEN + OUT_PACK) * 2
                      + (HIDDEN + 1) * 4)

    out = pl.pallas_call(
        _stuff_decoder_kernel,
        out_shape=jax.ShapeDtypeStruct((p_pad, OUT_PACK), jnp.bfloat16),
        grid_spec=grid_spec,
        compiler_params=pltpu.CompilerParams(
            dimension_semantics=("parallel",),
            vmem_limit_bytes=32 * 1024 * 1024),
        cost_estimate=pl.CostEstimate(
            flops=flops,
            transcendentals=p_pad * OUT_PACK,
            bytes_accessed=bytes_accessed),
    )(
        x,
        kparams["w_in"], kparams["b_in"],
        kparams["wm0"], kparams["bm0"],
        kparams["wm1"], kparams["bm1"],
        kparams["ws_row"], kparams["bs"],
        kparams["wf"], kparams["bf"],
    )

    # Padded rows (p_num..p_pad) hold garbage (tanh of biases) — sliced off here.
    feat = out[:p_num, :OUT_FEAT].astype(jnp.float32)
    sigma = out[:p_num, OUT_FEAT:OUT_FEAT + OUT_SIGMA].astype(jnp.float32)
    return feat, sigma


def reference_forward(w, pts, params):
    """Pure-JAX f32 reference mirroring the torch forward (default flags)."""
    pts = pts[..., :IN_CH]
    lrelu = lambda x: jnp.where(x > 0, x, 0.2 * x)
    f = lrelu(jnp.concatenate(
        [pts @ params["wp"] + params["bp"], w @ params["wz"] + params["bz"]],
        axis=-1))
    f = lrelu(f @ params["wm0"] + params["bm0"])
    sigma = f @ params["ws"] + params["bs"]
    f = lrelu(f @ params["wm1"] + params["bm1"])
    feat = jnp.tanh(f @ params["wf"] + params["bf"])
    # TODO(synk): fc_rgb is computed in the torch code but its output is
    # discarded, so it is intentionally skipped here as well.
    return feat, sigma


if __name__ == "__main__":
    key = jax.random.PRNGKey(0)
    k_params, k_w, k_pts = jax.random.split(key, 3)

    params = init_params(k_params)
    kparams = pack_params(params)

    # Small demo shapes; second case has a non-multiple-of-128 point count to
    # exercise the padding path.
    for P in (256, 77):
        kw, kp = jax.random.split(jax.random.fold_in(k_w, P))
        w = jax.random.normal(kw, (P, W_CH), jnp.float32)
        pts = jax.random.normal(kp, (P, 3), jnp.float32)

        feat, sigma = stuff_decoder_forward(w, pts, kparams)
        jax.block_until_ready((feat, sigma))

        feat_ref, sigma_ref = reference_forward(w, pts, params)
        assert feat.shape == (P, OUT_FEAT) and sigma.shape == (P, OUT_SIGMA)
        # bf16 MXU operands / bf16 activations with f32 accumulation -> relaxed
        # tolerances vs the f32 reference.
        assert jnp.allclose(feat, feat_ref, atol=3e-2, rtol=3e-2), (
            P, float(jnp.max(jnp.abs(feat - feat_ref))))
        assert jnp.allclose(sigma, sigma_ref, atol=3e-2, rtol=3e-2), (
            P, float(jnp.max(jnp.abs(sigma - sigma_ref))))

    print("KERNEL_OK")
</pallas_src>

<mosaic_0001>
module attributes {stable_mosaic.version = 11 : i64} {
  func.func @_stuff_decoder_kernel(%arg0: i32, %arg1: memref<128x32xbf16, #tpu.memory_space<vmem>>, %arg2: memref<32x256xbf16, #tpu.memory_space<vmem>>, %arg3: memref<1x256xbf16, #tpu.memory_space<vmem>>, %arg4: memref<256x256xbf16, #tpu.memory_space<vmem>>, %arg5: memref<1x256xbf16, #tpu.memory_space<vmem>>, %arg6: memref<256x256xbf16, #tpu.memory_space<vmem>>, %arg7: memref<1x256xbf16, #tpu.memory_space<vmem>>, %arg8: memref<1x256xf32, #tpu.memory_space<vmem>>, %arg9: memref<1x1xf32, #tpu.memory_space<vmem>>, %arg10: memref<256x128xbf16, #tpu.memory_space<vmem>>, %arg11: memref<1x128xbf16, #tpu.memory_space<vmem>>, %arg12: memref<128x128xbf16, #tpu.memory_space<vmem>>) attributes {dimension_semantics = [#tpu.dimension_semantics<parallel>], iteration_bounds = array<i64: 2>, scalar_prefetch = 0 : i64, scratch_operands = 0 : i64, tpu.core_type = #tpu.core_type<tc>, window_params = [{transform_indices = @transform_0, window_bounds = array<i64: 128, 32>}, {pipeline_mode = #tpu.pipeline_mode<synchronous>, transform_indices = @transform_1, window_bounds = array<i64: 32, 256>}, {pipeline_mode = #tpu.pipeline_mode<synchronous>, transform_indices = @transform_2, window_bounds = array<i64: 1, 256>}, {pipeline_mode = #tpu.pipeline_mode<synchronous>, transform_indices = @transform_3, window_bounds = array<i64: 256, 256>}, {pipeline_mode = #tpu.pipeline_mode<synchronous>, transform_indices = @transform_4, window_bounds = array<i64: 1, 256>}, {pipeline_mode = #tpu.pipeline_mode<synchronous>, transform_indices = @transform_5, window_bounds = array<i64: 256, 256>}, {pipeline_mode = #tpu.pipeline_mode<synchronous>, transform_indices = @transform_6, window_bounds = array<i64: 1, 256>}, {pipeline_mode = #tpu.pipeline_mode<synchronous>, transform_indices = @transform_7, window_bounds = array<i64: 1, 256>}, {pipeline_mode = #tpu.pipeline_mode<synchronous>, transform_indices = @transform_8, window_bounds = array<i64: 1, 1>}, {pipeline_mode = #tpu.pipeline_mode<synchronous>, transform_indices = @transform_9, window_bounds = array<i64: 256, 128>}, {pipeline_mode = #tpu.pipeline_mode<synchronous>, transform_indices = @transform_10, window_bounds = array<i64: 1, 128>}, {transform_indices = @transform_11, window_bounds = array<i64: 128, 128>}]} {
    %c0 = arith.constant 0 : index
    %c0_0 = arith.constant 0 : index
    %0 = vector.load %arg1[%c0, %c0_0] : memref<128x32xbf16, #tpu.memory_space<vmem>>, vector<128x32xbf16>
    %c0_1 = arith.constant 0 : index
    %c0_2 = arith.constant 0 : index
    %1 = vector.load %arg2[%c0_1, %c0_2] : memref<32x256xbf16, #tpu.memory_space<vmem>>, vector<32x256xbf16>
    %cst = arith.constant dense<0.000000e+00> : vector<128x256xf32>
    %2 = tpu.matmul %0, %1, %cst {dimension_numbers = #tpu.dot_dimension_numbers<[1], [0], [0], [1], [0, 0, 1, 1], [], []>} : vector<128x32xbf16>, vector<32x256xbf16>, vector<128x256xf32> -> vector<128x256xf32>
    %3 = arith.truncf %2 : vector<128x256xf32> to vector<128x256xbf16>
    %c0_3 = arith.constant 0 : index
    %c0_4 = arith.constant 0 : index
    %4 = vector.load %arg3[%c0_3, %c0_4] : memref<1x256xbf16, #tpu.memory_space<vmem>>, vector<1x256xbf16>
    %5 = vector.broadcast %4 : vector<1x256xbf16> to vector<128x256xbf16>
    %6 = arith.addf %3, %5 : vector<128x256xbf16>
    %cst_5 = arith.constant 2.001950e-01 : bf16
    %7 = vector.broadcast %cst_5 : bf16 to vector<128x256xbf16>
    %8 = arith.mulf %7, %6 : vector<128x256xbf16>
    %9 = arith.maximumf %6, %8 : vector<128x256xbf16>
    %c0_6 = arith.constant 0 : index
    %c0_7 = arith.constant 0 : index
    %10 = vector.load %arg4[%c0_6, %c0_7] : memref<256x256xbf16, #tpu.memory_space<vmem>>, vector<256x256xbf16>
    %cst_8 = arith.constant dense<0.000000e+00> : vector<128x256xf32>
    %11 = tpu.matmul %9, %10, %cst_8 {dimension_numbers = #tpu.dot_dimension_numbers<[1], [0], [0], [1], [0, 0, 1, 1], [], []>} : vector<128x256xbf16>, vector<256x256xbf16>, vector<128x256xf32> -> vector<128x256xf32>
    %12 = arith.truncf %11 : vector<128x256xf32> to vector<128x256xbf16>
    %c0_9 = arith.constant 0 : index
    %c0_10 = arith.constant 0 : index
    %13 = vector.load %arg5[%c0_9, %c0_10] : memref<1x256xbf16, #tpu.memory_space<vmem>>, vector<1x256xbf16>
    %14 = vector.broadcast %13 : vector<1x256xbf16> to vector<128x256xbf16>
    %15 = arith.addf %12, %14 : vector<128x256xbf16>
    %cst_11 = arith.constant 2.001950e-01 : bf16
    %16 = vector.broadcast %cst_11 : bf16 to vector<128x256xbf16>
    %17 = arith.mulf %16, %15 : vector<128x256xbf16>
    %18 = arith.maximumf %15, %17 : vector<128x256xbf16>
    %19 = arith.extf %18 : vector<128x256xbf16> to vector<128x256xf32>
    %c0_12 = arith.constant 0 : index
    %c0_13 = arith.constant 0 : index
    %20 = vector.load %arg8[%c0_12, %c0_13] : memref<1x256xf32, #tpu.memory_space<vmem>>, vector<1x256xf32>
    %21 = vector.broadcast %20 : vector<1x256xf32> to vector<128x256xf32>
    %22 = arith.mulf %19, %21 : vector<128x256xf32>
    %cst_14 = arith.constant dense<0.000000e+00> : vector<128xf32>
    %23 = vector.multi_reduction <add>, %22, %cst_14 [1] : vector<128x256xf32> to vector<128xf32>
    %24 = vector.shape_cast %23 : vector<128xf32> to vector<128x1xf32>
    %c0_15 = arith.constant 0 : index
    %c0_16 = arith.constant 0 : index
    %25 = vector.load %arg9[%c0_15, %c0_16] : memref<1x1xf32, #tpu.memory_space<vmem>>, vector<1x1xf32>
    %26 = vector.broadcast %25 : vector<1x1xf32> to vector<128x1xf32>
    %27 = arith.addf %24, %26 : vector<128x1xf32>
    %c0_17 = arith.constant 0 : index
    %c0_18 = arith.constant 0 : index
    %28 = vector.load %arg6[%c0_17, %c0_18] : memref<256x256xbf16, #tpu.memory_space<vmem>>, vector<256x256xbf16>
    %cst_19 = arith.constant dense<0.000000e+00> : vector<128x256xf32>
    %29 = tpu.matmul %18, %28, %cst_19 {dimension_numbers = #tpu.dot_dimension_numbers<[1], [0], [0], [1], [0, 0, 1, 1], [], []>} : vector<128x256xbf16>, vector<256x256xbf16>, vector<128x256xf32> -> vector<128x256xf32>
    %30 = arith.truncf %29 : vector<128x256xf32> to vector<128x256xbf16>
    %c0_20 = arith.constant 0 : index
    %c0_21 = arith.constant 0 : index
    %31 = vector.load %arg7[%c0_20, %c0_21] : memref<1x256xbf16, #tpu.memory_space<vmem>>, vector<1x256xbf16>
    %32 = vector.broadcast %31 : vector<1x256xbf16> to vector<128x256xbf16>
    %33 = arith.addf %30, %32 : vector<128x256xbf16>
    %cst_22 = arith.constant 2.001950e-01 : bf16
    %34 = vector.broadcast %cst_22 : bf16 to vector<128x256xbf16>
    %35 = arith.mulf %34, %33 : vector<128x256xbf16>
    %36 = arith.maximumf %33, %35 : vector<128x256xbf16>
    %c0_23 = arith.constant 0 : index
    %c0_24 = arith.constant 0 : index
    %37 = vector.load %arg10[%c0_23, %c0_24] : memref<256x128xbf16, #tpu.memory_space<vmem>>, vector<256x128xbf16>
    %cst_25 = arith.constant dense<0.000000e+00> : vector<128x128xf32>
    %38 = tpu.matmul %36, %37, %cst_25 {dimension_numbers = #tpu.dot_dimension_numbers<[1], [0], [0], [1], [0, 0, 1, 1], [], []>} : vector<128x256xbf16>, vector<256x128xbf16>, vector<128x128xf32> -> vector<128x128xf32>
    %39 = arith.truncf %38 : vector<128x128xf32> to vector<128x128xbf16>
    %c0_26 = arith.constant 0 : index
    %c0_27 = arith.constant 0 : index
    %40 = vector.load %arg11[%c0_26, %c0_27] : memref<1x128xbf16, #tpu.memory_space<vmem>>, vector<1x128xbf16>
    %41 = vector.broadcast %40 : vector<1x128xbf16> to vector<128x128xbf16>
    %42 = arith.addf %39, %41 : vector<128x128xbf16>
    %43 = math.tanh %42 : vector<128x128xbf16>
    %44 = tpu.iota {dimensions = array<i32: 1>} : vector<128x128xi32>
    %c64_i32 = arith.constant 64 : i32
    %45 = vector.broadcast %c64_i32 : i32 to vector<128x128xi32>
    %46 = arith.cmpi eq, %44, %45 : vector<128x128xi32>
    %47 = arith.truncf %27 : vector<128x1xf32> to vector<128x1xbf16>
    %48 = vector.shape_cast %47 : vector<128x1xbf16> to vector<128x1xbf16>
    %49 = vector.broadcast %48 : vector<128x1xbf16> to vector<128x128xbf16>
    %50 = arith.select %46, %49, %43 : vector<128x128xi1>, vector<128x128xbf16>
    %c0_28 = arith.constant 0 : index
    %c0_29 = arith.constant 0 : index
    %51 = vector.load %arg12[%c0_28, %c0_29] : memref<128x128xbf16, #tpu.memory_space<vmem>>, vector<128x128xbf16>
    tpu.vector_store %arg12[%c0_28, %c0_29], %50 {strides = array<i32>} : memref<128x128xbf16, #tpu.memory_space<vmem>>, vector<128x128xbf16>,
    return
  }
  func.func @transform_0(%arg0: i32) -> (i32, i32) {
    %c0_i32 = arith.constant 0 : i32
    %c0_i32_0 = arith.constant 0 : i32
    return %arg0, %c0_i32 : i32, i32
  }
  func.func @transform_1(%arg0: i32) -> (i32, i32) {
    %c0_i32 = arith.constant 0 : i32
    %c0_i32_0 = arith.constant 0 : i32
    %c0_i32_1 = arith.constant 0 : i32
    return %c0_i32, %c0_i32_0 : i32, i32
  }
  func.func @transform_2(%arg0: i32) -> (i32, i32) {
    %c0_i32 = arith.constant 0 : i32
    %c0_i32_0 = arith.constant 0 : i32
    %c0_i32_1 = arith.constant 0 : i32
    return %c0_i32, %c0_i32_0 : i32, i32
  }
  func.func @transform_3(%arg0: i32) -> (i32, i32) {
    %c0_i32 = arith.constant 0 : i32
    %c0_i32_0 = arith.constant 0 : i32
    %c0_i32_1 = arith.constant 0 : i32
    return %c0_i32, %c0_i32_0 : i32, i32
  }
  func.func @transform_4(%arg0: i32) -> (i32, i32) {
    %c0_i32 = arith.constant 0 : i32
    %c0_i32_0 = arith.constant 0 : i32
    %c0_i32_1 = arith.constant 0 : i32
    return %c0_i32, %c0_i32_0 : i32, i32
  }
  func.func @transform_5(%arg0: i32) -> (i32, i32) {
    %c0_i32 = arith.constant 0 : i32
    %c0_i32_0 = arith.constant 0 : i32
    %c0_i32_1 = arith.constant 0 : i32
    return %c0_i32, %c0_i32_0 : i32, i32
  }
  func.func @transform_6(%arg0: i32) -> (i32, i32) {
    %c0_i32 = arith.constant 0 : i32
    %c0_i32_0 = arith.constant 0 : i32
    %c0_i32_1 = arith.constant 0 : i32
    return %c0_i32, %c0_i32_0 : i32, i32
  }
  func.func @transform_7(%arg0: i32) -> (i32, i32) {
    %c0_i32 = arith.constant 0 : i32
    %c0_i32_0 = arith.constant 0 : i32
    %c0_i32_1 = arith.constant 0 : i32
    return %c0_i32, %c0_i32_0 : i32, i32
  }
  func.func @transform_8(%arg0: i32) -> (i32, i32) {
    %c0_i32 = arith.constant 0 : i32
    %c0_i32_0 = arith.constant 0 : i32
    %c0_i32_1 = arith.constant 0 : i32
    return %c0_i32, %c0_i32_0 : i32, i32
  }
  func.func @transform_9(%arg0: i32) -> (i32, i32) {
    %c0_i32 = arith.constant 0 : i32
    %c0_i32_0 = arith.constant 0 : i32
    %c0_i32_1 = arith.constant 0 : i32
    return %c0_i32, %c0_i32_0 : i32, i32
  }
  func.func @transform_10(%arg0: i32) -> (i32, i32) {
    %c0_i32 = arith.constant 0 : i32
    %c0_i32_0 = arith.constant 0 : i32
    %c0_i32_1 = arith.constant 0 : i32
    return %c0_i32, %c0_i32_0 : i32, i32
  }
  func.func @transform_11(%arg0: i32) -> (i32, i32) {
    %c0_i32 = arith.constant 0 : i32
    %c0_i32_0 = arith.constant 0 : i32
    return %arg0, %c0_i32 : i32, i32
  }
}

</mosaic_0001>

<bundles_post_ra>
// kernel: stuff_decoder_forward.1
= control target key start
LH: loop header
LB: loop body
LE: loop exit
PB: predicated region body
PF: predicated region fallthrough
CT: control target
= control target key end

     0   :  { %s3266_s0 = inlined_call_operand.vmem [shape: bf16[256,32], index: 0, kind: input, shape index: {}]   ;;  %s3267_s1 = inlined_call_operand.hbm [shape: bf16[32,256], index: 1, kind: input, shape index: {}]   ;;  %s3268_s2 = inlined_call_operand.vmem [shape: bf16[1,256], index: 2, kind: input, shape index: {}]   ;;  %s3269_s3 = inlined_call_operand.vmem [shape: bf16[256,256], index: 3, kind: input, shape index: {}]   ;;  %s3270_s4 = inlined_call_operand.vmem [shape: bf16[1,256], index: 4, kind: input, shape index: {}]   ;;  %s3271_s5 = inlined_call_operand.vmem [shape: bf16[256,256], index: 5, kind: input, shape index: {}]   ;;  %s3272_s6 = inlined_call_operand.vmem [shape: bf16[1,256], index: 6, kind: input, shape index: {}]   ;;  %s3273_s7 = inlined_call_operand.vmem [shape: f32[1,256], index: 7, kind: input, shape index: {}]   ;;  %s3274_s8 = inlined_call_operand.<no memory space> [shape: f32[1,1], index: 8, kind: input, shape index: {}]   ;;  %s3275_s9 = inlined_call_operand.hbm [shape: bf16[256,128], index: 9, kind: input, shape index: {}]   ;;  %s3276_s10 = inlined_call_operand.hbm [shape: bf16[1,128], index: 10, kind: input, shape index: {}]   ;;  %s3277_s11 = inlined_call_operand.vmem [shape: bf16[256,128], index: 11, kind: output, shape index: {}]  }
   0x1   :  { %v16_v0 = vstv %s3274_s8 }
   0x2   :  { %17 = vst [vmem:[#allocation2] sm:$0x1] %v16_v0 }
   0x3   :  { %18 = vsyncpa [#allocation4], 0 }
   0x4   :  { %19 = vsyncpa [#allocation6], 0  ;;  %s2773_s19 = smov 0  }
   0x5 LB: > { %s2701_s20 = smov [#allocation5]   ;;  %s2201_s22 = sadd.s32 4294967295, %s2699_s19   ;;  %s2699_s19 = sphi %s2773_s19, %s25_s19  }
   0x6   : > { %s338_s21 = sshll.u32 %s2701_s20, 4  ;;  %p2203_p0 = scmp.ge.s32.totalorder %s2699_s19, 1  ;;  %s339_s21 = int_to_ptr.vmem [resolvable:$true] %s338_s21 }
   0x7   : > { %p292_p1 = scmp.lt.s32.totalorder %s2699_s19, 3  ;;  %p2783_p2 = scmp.eq.s32.totalorder %s2201_s22, 0 }
   0x8   : > { %s2702_s24 = smov [#allocation3]   ;;  %s2703_s27 = smov [#allocation7]  }
   0x9   : > { %p2787_p3 = pnand %p2203_p0, %p292_p1  ;;  %s304_s25 = sshll.u32 %s2702_s24, 4  ;;  %s2793_s25 = int_to_ptr.vmem [resolvable:$true] %s304_s25 }
   0xa   : > { %s2801_s28 = sshll.u32 %s2703_s27, 4  ;;  %s2618_s29 = scalar_lea.vmem %s339_s21, 2048  ;;  %s353_s28 = int_to_ptr.vmem [resolvable:$true] %s2801_s28 }
   0xb   : > { %p2430_p4 = pneg %p2787_p3  ;;  %p2619_p7 = scmp.ne.s32.totalorder %s339_s21, %s2618_s29 }
   0xc   : > { %p2626_p10 = scmp.lt.s32.totalorder %s339_s21, %s339_s21  ;;  %p2627_p11 = scmp.lt.s32.totalorder %s2618_s29, %s2618_s29 }
   0xd   : > { %p2797_p5 = pnand %p2783_p2, %p2430_p4 }
   0xe   : > { %p2628_p12 = por %p2627_p11, %p2626_p10 }
   0xf   : > { %p2609_p6 = pneg %p2797_p5 }
  0x11   : > { %p2621_p8 = pnand %p2619_p7, %p2609_p6 }
  0x13   : > { %p2622_p9 = pneg %p2621_p8 }
  0x15   : > { %p2629_p13 = pnand %p2628_p12, %p2622_p9 }
  0x17   : > { %2632 = shalt.err (!%p2629_p13)
}
  0x18   : > { %s2704_s30 = smov 64   ;;  %s2705_s12 = smov 4  }
  0x19   : > { %2436 = dma.hbm_to_vmem [thread:$0]  (!%p2797_p5), %s3275_s9, 2048, %s339_s21, [#allocation6], %s2704_s30, %s2704_s30, %s2705_s12  }
  0x1a   : > { %s2644_s15 = scalar_lea.vmem %s2793_s25, 512  ;;  %p2652_p7 = scmp.lt.s32.totalorder %s2793_s25, %s2793_s25 }
  0x1b   : > { %p2645_p0 = scmp.ne.s32.totalorder %s2793_s25, %s2644_s15  ;;  %p2653_p8 = scmp.lt.s32.totalorder %s2644_s15, %s2644_s15 }
  0x1d   : > { %p2647_p1 = pnand %p2645_p0, %p2609_p6  ;;  %p2654_p9 = por %p2653_p8, %p2652_p7 }
  0x1f   : > { %p2648_p4 = pneg %p2647_p1 }
  0x21   : > { %p2655_p10 = pnand %p2654_p9, %p2648_p4 }
  0x23   : > { %2658 = shalt.err (!%p2655_p10)
}
  0x24   : > { %s2706_s16 = smov 128   ;;  %s2707_s17 = smov 8  }
  0x25   : > { %2433 = dma.hbm_to_vmem [thread:$0]  (!%p2797_p5), %s3267_s1, 512, %s2793_s25, [#allocation4], %s2706_s16, %s2706_s16, %s2707_s17  }
  0x26   : > { %s2670_s21 = scalar_lea.vmem %s353_s28, 16  ;;  %s2677_s24 = scalar_lea.vmem %s353_s28, 32 }
  0x27   : > { %p2671_p11 = scmp.ne.s32.totalorder %s353_s28, %s2670_s21  ;;  %p2678_p0 = scmp.lt.s32.totalorder %s353_s28, %s353_s28 }
  0x28   : > { %p2679_p1 = scmp.lt.s32.totalorder %s2677_s24, %s2670_s21 }
  0x29   : > { %p2673_p12 = pnand %p2671_p11, %p2609_p6 }
  0x2a   : > { %p2680_p4 = por %p2679_p1, %p2678_p0 }
  0x2b   : > { %p2674_p13 = pneg %p2673_p12 }
  0x2d   : > { %p2681_p7 = pnand %p2680_p4, %p2674_p13 }
  0x2f   : > { %2684 = shalt.err (!%p2681_p7)
}
  0x30   : > { %2439 = dma.hbm_to_vmem [thread:$0]  (!%p2797_p5), %s3276_s10, 16, %s353_s28, [#allocation6]  }
  0x31   : > { %374 = sbr.rel (%p2787_p3) target bundleno = 971 (0x3cb), region = 64 }
  0x36   : > { %2690 = dma.done.wait (%p2783_p2), [#allocation4], 512  }
  0x37   : > { %2692 = vsyncadd (%p2783_p2), [#allocation4], 4294966784 }
  0x38   : > { %2694 = dma.done.wait (%p2783_p2), [#allocation6], 2064  }
  0x39   : > { %2696 = vsyncadd (%p2783_p2), [#allocation6], 4294965232  ;;  %s2212_s25 = sshll.u32 %s2201_s22, 4  ;;  %v2708_v1 = vmov 0   ;;  %v2465_v2 = vld [vmem:[#allocation3 + $0x14] ss:$8 sps:$4 sm:$0xff]  }
  0x3a   : > { %575 = vmatprep.mubr.bf16.mxu0 %v2708_v1  ;;  %p423_p5 = scmp.lt.s32.totalorder %s2212_s25, 31  ;;  %2463 = vset.pattern.permute.xlu0 %v2708_v1  ;;  %v2467_v3 = vld [vmem:[#allocation3 + $0x10] ss:$8 sps:$4 sm:$0xff]   ;;  %v2468_v4 = vld [vmem:[#allocation3 + $0x4] ss:$8 sps:$4 sm:$0xff]   ;;  %vm518_vm0 = vcmask 261120  }
  0x3b   : > { %2464 = vset.pattern.permute.xlu1 %v2708_v1  ;;  %555 = vmatprep.subr.bf16.mxu0 %v2465_v2  ;;  %v2470_v5 = vld [vmem:[#allocation3] ss:$8 sps:$4 sm:$0xff]   ;;  %v2479_v7 = vld [vmem:[%s3269_s3 + $0x74] ss:$8 sps:$4 sm:$0xff]   ;;  %v2481_v8 = vld [vmem:[%s3269_s3 + $0x70] ss:$8 sps:$4 sm:$0xff]  }
  0x3c   : > { %s3284_s25 = smov (!%p423_p5, %s2212_s25), 31  ;;  %556 = vmatpush1.bf16.msra.mxu0 %v2467_v3  ;;  %v2482_v9 = vld [vmem:[%s3269_s3 + $0x64] ss:$8 sps:$4 sm:$0xff]   ;;  %950 = vmatprep.subr.bf16.mxu1 %v2479_v7  ;;  %v2484_v11 = vld [vmem:[%s3269_s3 + $0x60] ss:$8 sps:$4 sm:$0xff]  }
  0x3d   : > { %s2213_s23 = sshll.u32 %s3284_s25, 2  ;;  %557 = vmatprep.subr.bf16.mxu0 %v2468_v4  ;;  %951 = vmatpush1.bf16.msra.mxu1 %v2481_v8  ;;  %v2485_v12 = vld [vmem:[%s3269_s3 + $0x54] ss:$8 sps:$4 sm:$0xff]   ;;  %v2487_v13 = vld [vmem:[%s3269_s3 + $0x50] ss:$8 sps:$4 sm:$0xff]  }
  0x3e   : > { %s2858_s22 = scalar_lea.vmem %s3266_s0, %s2213_s23  ;;  %952 = vmatprep.subr.bf16.mxu1 %v2482_v9  ;;  %v2488_v14 = vld [vmem:[%s3269_s3 + $0x44] ss:$8 sps:$4 sm:$0xff]   ;;  %v2490_v16 = vld [vmem:[%s3269_s3 + $0x40] ss:$8 sps:$4 sm:$0xff]   ;;  %v2491_v17 = vld [vmem:[%s3269_s3 + $0x34] ss:$8 sps:$4 sm:$0xff]   ;;  %s3224_s15 = scalar_lea.vmem %s3277_s11, %s2213_s23 }
  0x3f   : > { %v2471_v6 = vld [vmem:[%s2858_s22] sm:$0xff]   ;;  %v2472_v10 = vld [vmem:[%s2858_s22 + $0x8] sm:$0xff]   ;;  %v2473_v15 = vld [vmem:[%s2858_s22 + $0x10] sm:$0xff]   ;;  %v2709_v4 = vmov 1966171168  }
  0x40   : > { %558 = vmatpush1.bf16.msra.mxu0 %v2470_v5  ;;  %v2493_v18 = vld [vmem:[%s3269_s3 + $0x30] ss:$8 sps:$4 sm:$0xff]   ;;  %v2494_v19 = vld [vmem:[%s3269_s3 + $0x24] ss:$8 sps:$4 sm:$0xff]   ;;  %v2496_v21 = vld [vmem:[%s3269_s3 + $0x20] ss:$8 sps:$4 sm:$0xff]   ;;  %v683_v5 = vunpack.c.l.s4 %v2709_v4 }
  0x41   : > { %953 = vmatpush1.bf16.msra.mxu1 %v2484_v11  ;;  %v2474_v20 = vld [vmem:[%s2858_s22 + $0x18] sm:$0xff]   ;;  %v2500_v24 = vld [vmem:[%s3269_s3 + $0x4] ss:$8 sps:$4 sm:$0xff]   ;;  %v2502_v26 = vld [vmem:[%s3269_s3] ss:$8 sps:$4 sm:$0xff]  }
  0x42   : > { %954 = vmatprep.subr.bf16.mxu1 %v2485_v12  ;;  %v2497_v22 = vld [vmem:[%s3269_s3 + $0x14] ss:$8 sps:$4 sm:$0xff]   ;;  %v2499_v23 = vld [vmem:[%s3269_s3 + $0x10] ss:$8 sps:$4 sm:$0xff]   ;;  %v2475_v25 = vld [vmem:[%s2858_s22 + $0x20] sm:$0xff]   ;;  %v684_v9 = vunpack.c.0.s8 %v683_v5 }
  0x43   : > { %2228 = vmatmul.mubr.msk.bf16.vlgmr.msra.gmra.mxu0 %vm518_vm0, %v2471_v6  ;;  %v2503_v27 = vld [vmem:[%s3269_s3 + $0xf4] ss:$8 sps:$4 sm:$0xff]   ;;  %v2505_v28 = vld [vmem:[%s3269_s3 + $0xf0] ss:$8 sps:$4 sm:$0xff]   ;;  %v2506_v29 = vld [vmem:[%s3269_s3 + $0xe4] ss:$8 sps:$4 sm:$0xff]   ;;  %v685_v6 = vlaneseq }
  0x44   : > { %585 = vmatprep.mubr.bf16.mxu0 %v2708_v1  ;;  %v2476_v30 = vld [vmem:[%s2858_s22 + $0x28] sm:$0xff]   ;;  %v2509_v32 = vld [vmem:[%s3269_s3 + $0xd4] ss:$8 sps:$4 sm:$0xff]   ;;  %v2511_v33 = vld [vmem:[%s3269_s3 + $0xd0] ss:$8 sps:$4 sm:$0xff]  }
  0x45   : > { %955 = vmatpush1.bf16.msra.mxu1 %v2487_v13  ;;  %v2508_v31 = vld [vmem:[%s3269_s3 + $0xe0] ss:$8 sps:$4 sm:$0xff]   ;;  %v2512_v34 = vld [vmem:[%s3269_s3 + $0xc4] ss:$8 sps:$4 sm:$0xff]   ;;  %v2477_v35 = vld [vmem:[%s2858_s22 + $0x30] sm:$0xff]  }
  0x46   : > { %956 = vmatprep.subr.bf16.mxu1 %v2488_v14  ;;  %v2514_v36 = vld [vmem:[%s3269_s3 + $0xc0] ss:$8 sps:$4 sm:$0xff]   ;;  %v2478_v37 = vld [vmem:[%s2858_s22 + $0x38] sm:$0xff]   ;;  %v2518_v40 = vld [vmem:[%s3269_s3 + $0xa4] ss:$8 sps:$4 sm:$0xff]  }
  0x47   : > { %v2515_v38 = vld [vmem:[%s3269_s3 + $0xb4] ss:$8 sps:$4 sm:$0xff]   ;;  %v2517_v39 = vld [vmem:[%s3269_s3 + $0xb0] ss:$8 sps:$4 sm:$0xff]   ;;  %v2520_v41 = vld [vmem:[%s3269_s3 + $0xa0] ss:$8 sps:$4 sm:$0xff]  }
  0x48   : > { %v2521_v42 = vld [vmem:[%s3269_s3 + $0x94] ss:$8 sps:$4 sm:$0xff]   ;;  %v2523_v43 = vld [vmem:[%s3269_s3 + $0x90] ss:$8 sps:$4 sm:$0xff]   ;;  %v2524_v44 = vld [vmem:[%s3269_s3 + $0x84] ss:$8 sps:$4 sm:$0xff]  }
  0x49   : > { %957 = vmatpush1.bf16.msra.mxu1 %v2490_v16  ;;  %v2526_v45 = vld [vmem:[%s3269_s3 + $0x80] ss:$8 sps:$4 sm:$0xff]   ;;  %v2527_v46 = vld [vmem:[%s3271_s5 + $0x70] ss:$8 sps:$4 sm:$0xff]   ;;  %v2529_v47 = vld [vmem:[%s3271_s5 + $0x74] ss:$8 sps:$4 sm:$0xff]  }
  0x4a   : > { %958 = vmatprep.subr.bf16.mxu1 %v2491_v17  ;;  %v2532_v48 = vld [vmem:[%s3271_s5 + $0x64] ss:$8 sps:$4 sm:$0xff]   ;;  %1504 = vmatprep.subr.bf16.mxu0 %v2529_v47  ;;  %v2530_v49 = vld [vmem:[%s3271_s5 + $0x60] ss:$8 sps:$4 sm:$0xff]   ;;  %v2535_v50 = vld [vmem:[%s3271_s5 + $0x54] ss:$8 sps:$4 sm:$0xff]  }
  0x4b   : > { %2229 = vmatmul.mubr.msk.bf16.gmra.mxu0 %vm518_vm0, %v2472_v10  ;;  %v2533_v51 = vld [vmem:[%s3271_s5 + $0x50] ss:$8 sps:$4 sm:$0xff]   ;;  %v2538_v52 = vld [vmem:[%s3271_s5 + $0x44] ss:$8 sps:$4 sm:$0xff]   ;;  %v2536_v53 = vld [vmem:[%s3271_s5 + $0x40] ss:$8 sps:$4 sm:$0xff]  }
  0x4c   : > { %595 = vmatprep.mubr.bf16.mxu0 %v2708_v1  ;;  %1505 = vmatpush1.bf16.msra.mxu0 %v2527_v46  ;;  %v2541_v54 = vld [vmem:[%s3271_s5 + $0x34] ss:$8 sps:$4 sm:$0xff]   ;;  %v2539_v55 = vld [vmem:[%s3271_s5 + $0x30] ss:$8 sps:$4 sm:$0xff]   ;;  %v2544_v56 = vld [vmem:[%s3271_s5 + $0x24] ss:$8 sps:$4 sm:$0xff]  }
  0x4d   : > { %959 = vmatpush1.bf16.msra.mxu1 %v2493_v18  ;;  %1506 = vmatprep.subr.bf16.mxu0 %v2532_v48  ;;  %v2542_v57 = vld [vmem:[%s3271_s5 + $0x20] ss:$8 sps:$4 sm:$0xff]   ;;  %v2547_v58 = vld [vmem:[%s3271_s5 + $0x14] ss:$8 sps:$4 sm:$0xff]   ;;  %v2545_v59 = vld [vmem:[%s3271_s5 + $0x10] ss:$8 sps:$4 sm:$0xff]  }
  0x4e   : > { %960 = vmatprep.subr.bf16.mxu1 %v2494_v19  ;;  %v2550_v60 = vld [vmem:[%s3271_s5 + $0x4] ss:$8 sps:$4 sm:$0xff]   ;;  %v2548_v61 = vld [vmem:[%s3271_s5] ss:$8 sps:$4 sm:$0xff]   ;;  %v2553_v62 = vld [vmem:[%s3271_s5 + $0xf4] ss:$8 sps:$4 sm:$0xff]  }
  0x4f   : > { %v2551_v63 = vld [vmem:[%s3271_s5 + $0xf0] ss:$8 sps:$4 sm:$0xff]   ;;  %v2556_v0 = vld [vmem:[%s3271_s5 + $0xe4] ss:$8 sps:$4 sm:$0xff]   ;;  %v2554_v2 = vld [vmem:[%s3271_s5 + $0xe0] ss:$8 sps:$4 sm:$0xff]  }
  0x50   : > { %1507 = vmatpush1.bf16.msra.mxu0 %v2530_v49  ;;  %v2559_v3 = vld [vmem:[%s3271_s5 + $0xd4] ss:$8 sps:$4 sm:$0xff]   ;;  %v2557_v7 = vld [vmem:[%s3271_s5 + $0xd0] ss:$8 sps:$4 sm:$0xff]   ;;  %v2562_v8 = vld [vmem:[%s3271_s5 + $0xc4] ss:$8 sps:$4 sm:$0xff]  }
  0x51   : > { %961 = vmatpush1.bf16.msra.mxu1 %v2496_v21  ;;  %1508 = vmatprep.subr.bf16.mxu0 %v2535_v50  ;;  %v3049_v10 = vshrl.u32 %v685_v6, 7  ;;  %v2560_v11 = vld [vmem:[%s3271_s5 + $0xc0] ss:$8 sps:$4 sm:$0xff]   ;;  %v2565_v12 = vld [vmem:[%s3271_s5 + $0xb4] ss:$8 sps:$4 sm:$0xff]  }
  0x52   : > { %962 = vmatprep.subr.bf16.mxu1 %v2497_v22  ;;  %v2236_v13 = vld.sshfl [vmem:[%s3268_s2] sm:$0x11 pattern:$0x75316420] }
  0x53   : > { %2230 = vmatmul.mubr.msk.bf16.gmra.mxu0 %vm518_vm0, %v2473_v15  ;;  %v3061_v14 = vsub.s32 %v684_v9, %v3049_v10  ;;  %v2563_v15 = vld [vmem:[%s3271_s5 + $0xb0] ss:$8 sps:$4 sm:$0xff]   ;;  %v681_v16 = vcombine.high %v2236_v13, %v2236_v13 }
  0x54   : > { %605 = vmatprep.mubr.bf16.mxu0 %v2708_v1  ;;  %1509 = vmatpush1.bf16.msra.mxu0 %v2533_v51 }
  0x55   : > { %963 = vmatpush1.bf16.msra.mxu1 %v2499_v23  ;;  %1510 = vmatprep.subr.bf16.mxu0 %v2538_v52  ;;  %v688_v17 = vrot.slane %v2236_v13, %v3061_v14  ;;  %v695_v18 = vrot.slane %v681_v16, %v3061_v14 }
  0x56   : > { %964 = vmatprep.subr.bf16.mxu1 %v2500_v24 }
  0x57   : > { %v697_v19 = vpack.i.b16 %v688_v17, %v688_v17  ;;  %v704_v22 = vpack.i.b16 %v695_v18, %v695_v18 }
  0x58   : > { %1511 = vmatpush1.bf16.msra.mxu0 %v2536_v53 }
  0x59   : > { %965 = vmatpush1.bf16.msra.mxu1 %v2502_v26  ;;  %1512 = vmatprep.subr.bf16.mxu0 %v2541_v54 }
  0x5a   : > { %966 = vmatprep.subr.bf16.mxu1 %v2503_v27 }
  0x5b   : > { %2231 = vmatmul.mubr.msk.bf16.gmra.mxu0 %vm518_vm0, %v2474_v20  ;;  %v3069_v20 = vsub.s32 0, %v3049_v10 }
  0x5c   : > { %615 = vmatprep.mubr.bf16.mxu0 %v2708_v1  ;;  %1513 = vmatpush1.bf16.msra.mxu0 %v2539_v55 }
  0x5d   : > { %967 = vmatpush2.bf16.msra.mxu1 %v2505_v28  ;;  %1514 = vmatprep.subr.bf16.mxu0 %v2544_v56  ;;  %v3072_v24 = vrot.slane %v697_v19, %v3069_v20  ;;  %v3075_v27 = vrot.slane %v704_v22, %v3069_v20 }
  0x5e   : > { %968 = vmatprep.subr.bf16.mxu1 %v2506_v29 }
  0x60   : > { %1515 = vmatpush1.bf16.msra.mxu0 %v2542_v57 }
  0x61   : > { %969 = vmatpush2.bf16.msra.mxu1 %v2508_v31  ;;  %1516 = vmatprep.subr.bf16.mxu0 %v2547_v58 }
  0x62   : > { %970 = vmatprep.subr.bf16.mxu1 %v2509_v32 }
  0x63   : > { %2232 = vmatmul.mubr.msk.bf16.gmra.mxu0 %vm518_vm0, %v2475_v25 }
  0x64   : > { %625 = vmatprep.mubr.bf16.mxu0 %v2708_v1  ;;  %1517 = vmatpush1.bf16.msra.mxu0 %v2545_v59 }
  0x65   : > { %971 = vmatpush2.bf16.msra.mxu1 %v2511_v33  ;;  %1518 = vmatprep.subr.bf16.mxu0 %v2550_v60 }
  0x66   : > { %972 = vmatprep.subr.bf16.mxu1 %v2512_v34 }
  0x68   : > { %1519 = vmatpush1.bf16.msra.mxu0 %v2548_v61 }
  0x69   : > { %973 = vmatpush2.bf16.msra.mxu1 %v2514_v36  ;;  %1520 = vmatprep.subr.bf16.mxu0 %v2553_v62 }
  0x6a   : > { %974 = vmatprep.subr.bf16.mxu1 %v2515_v38 }
  0x6b   : > { %2233 = vmatmul.mubr.msk.bf16.gmra.mxu0 %vm518_vm0, %v2476_v30 }
  0x6c   : > { %635 = vmatprep.mubr.bf16.mxu0 %v2708_v1  ;;  %1521 = vmatpush2.bf16.msra.mxu0 %v2551_v63 }
  0x6d   : > { %975 = vmatpush2.bf16.msra.mxu1 %v2517_v39  ;;  %1522 = vmatprep.subr.bf16.mxu0 %v2556_v0 }
  0x6e   : > { %976 = vmatprep.subr.bf16.mxu1 %v2518_v40 }
  0x70   : > { %1523 = vmatpush2.bf16.msra.mxu0 %v2554_v2 }
  0x71   : > { %977 = vmatpush2.bf16.msra.mxu1 %v2520_v41  ;;  %1524 = vmatprep.subr.bf16.mxu0 %v2559_v3 }
  0x72   : > { %978 = vmatprep.subr.bf16.mxu1 %v2521_v42 }
  0x73   : > { %2234 = vmatmul.mubr.msk.bf16.gmra.mxu0 %vm518_vm0, %v2477_v35 }
  0x74   : > { %645 = vmatprep.mubr.bf16.mxu0 %v2708_v1  ;;  %1525 = vmatpush2.bf16.msra.mxu0 %v2557_v7 }
  0x75   : > { %979 = vmatpush2.bf16.msra.mxu1 %v2523_v43  ;;  %1526 = vmatprep.subr.bf16.mxu0 %v2562_v8 }
  0x76   : > { %980 = vmatprep.subr.bf16.mxu1 %v2524_v44 }
  0x78   : > { %1527 = vmatpush2.bf16.msra.mxu0 %v2560_v11 }
  0x79   : > { %981 = vmatpush2.bf16.msra.mxu1 %v2526_v45  ;;  %1528 = vmatprep.subr.bf16.mxu0 %v2565_v12 }
  0x7b   : > { %2235 = vmatmul.mubr.msk.bf16.gmra.mxu0 %vm518_vm0, %v2478_v37 }
  0x7c   : > { %1529 = vmatpush2.bf16.msra.mxu0 %v2563_v15 }
 0x103   : > { %v577_v21 = vpop.f32.mrf.mxu0 }
 0x105   : > { %v579_v23 = vpop.f32.mrf.mxu0 }
 0x107   : > { %v581_v25 = vpop.f32.mrf.mxu0 }
 0x108   : > { %v656_v26 = vpack.c.bf16 %v581_v25, %v577_v21 }
 0x109   : > { %v583_v28 = vpop.f32.mrf.mxu0 }
 0x10a   : > { %v710_v29 = vadd.bf16 %v3072_v24, %v656_v26  ;;  %v657_v30 = vpack.c.bf16 %v583_v28, %v579_v23 }
 0x10b   : > { %v587_v31 = vpop.f32.mrf.mxu0 }
 0x10c   : > { %v711_v32 = vadd.bf16 %v3075_v27, %v657_v30  ;;  %v726_v33 = vmul.bf16 1045249613, %v710_v29 }
 0x10d   : > { %v589_v34 = vpop.f32.mrf.mxu0 }
 0x10e   : > { %v727_v35 = vmul.bf16 1045249613, %v711_v32  ;;  %v742_v40 = vmax.bf16 %v726_v33, %v710_v29 }
 0x10f   : > { %v591_v36 = vpop.f32.mrf.mxu0 }
 0x110   : > { %v658_v37 = vpack.c.bf16 %v591_v36, %v587_v31  ;;  %v743_v38 = vmax.bf16 %v727_v35, %v711_v32 }
 0x111   : > { %v593_v39 = vpop.f32.mrf.mxu0 }
 0x112   : > { %v712_v41 = vadd.bf16 %v3072_v24, %v658_v37  ;;  %v659_v42 = vpack.c.bf16 %v593_v39, %v589_v34  ;;  %982 = vmatprep.mubr.bf16.mxu1 %v743_v38 }
 0x113   : > { %v597_v43 = vpop.f32.mrf.mxu0  ;;  %983 = vmatmul.mubr.bf16.vlgmr.msra.gmra.mxu1 %v742_v40 }
 0x114   : > { %v713_v44 = vadd.bf16 %v3075_v27, %v659_v42  ;;  %v728_v45 = vmul.bf16 1045249613, %v712_v41 }
 0x115   : > { %v599_v46 = vpop.f32.mrf.mxu0 }
 0x116   : > { %v729_v47 = vmul.bf16 1045249613, %v713_v44  ;;  %v744_v52 = vmax.bf16 %v728_v45, %v712_v41 }
 0x117   : > { %v601_v48 = vpop.f32.mrf.mxu0 }
 0x118   : > { %v660_v49 = vpack.c.bf16 %v601_v48, %v597_v43  ;;  %v745_v50 = vmax.bf16 %v729_v47, %v713_v44 }
 0x119   : > { %v603_v51 = vpop.f32.mrf.mxu0 }
 0x11a   : > { %v714_v53 = vadd.bf16 %v3072_v24, %v660_v49  ;;  %v661_v54 = vpack.c.bf16 %v603_v51, %v599_v46  ;;  %992 = vmatprep.mubr.bf16.mxu1 %v745_v50 }
 0x11b   : > { %v607_v55 = vpop.f32.mrf.mxu0  ;;  %993 = vmatmul.mubr.bf16.gmra.mxu1 %v744_v52 }
 0x11c   : > { %v715_v56 = vadd.bf16 %v3075_v27, %v661_v54  ;;  %v730_v57 = vmul.bf16 1045249613, %v714_v53 }
 0x11d   : > { %v609_v58 = vpop.f32.mrf.mxu0 }
 0x11e   : > { %v731_v59 = vmul.bf16 1045249613, %v715_v56  ;;  %v746_v0 = vmax.bf16 %v730_v57, %v714_v53 }
 0x11f   : > { %v611_v60 = vpop.f32.mrf.mxu0 }
 0x120   : > { %v662_v61 = vpack.c.bf16 %v611_v60, %v607_v55  ;;  %v747_v62 = vmax.bf16 %v731_v59, %v715_v56 }
 0x121   : > { %v613_v63 = vpop.f32.mrf.mxu0 }
 0x122   : > { %v716_v2 = vadd.bf16 %v3072_v24, %v662_v61  ;;  %v663_v3 = vpack.c.bf16 %v613_v63, %v609_v58  ;;  %1002 = vmatprep.mubr.bf16.mxu1 %v747_v62  ;;  %v2566_v63 = vld [vmem:[%s3271_s5 + $0xa0] ss:$8 sps:$4 sm:$0xff]  }
 0x123   : > { %v617_v4 = vpop.f32.mrf.mxu0  ;;  %1003 = vmatmul.mubr.bf16.gmra.mxu1 %v746_v0  ;;  %v2568_v0 = vld [vmem:[%s3271_s5 + $0xa4] ss:$8 sps:$4 sm:$0xff]  }
 0x124   : > { %v717_v5 = vadd.bf16 %v3075_v27, %v663_v3  ;;  %v732_v7 = vmul.bf16 1045249613, %v716_v2  ;;  %1530 = vmatprep.subr.bf16.mxu0 %v2568_v0  ;;  %v2572_v3 = vld [vmem:[%s3271_s5 + $0x80] ss:$8 sps:$4 sm:$0xff]  }
 0x125   : > { %v619_v8 = vpop.f32.mrf.mxu0  ;;  %1531 = vmatpush2.bf16.msra.mxu0 %v2566_v63 }
 0x126   : > { %v733_v9 = vmul.bf16 1045249613, %v717_v5  ;;  %v748_v16 = vmax.bf16 %v732_v7, %v716_v2  ;;  %v2574_v2 = vld [vmem:[%s3271_s5 + $0x84] ss:$8 sps:$4 sm:$0xff]  }
 0x127   : > { %v621_v11 = vpop.f32.mrf.mxu0 }
 0x128   : > { %v664_v12 = vpack.c.bf16 %v621_v11, %v617_v4  ;;  %v749_v13 = vmax.bf16 %v733_v9, %v717_v5  ;;  %v2269_v4 = vld.sshfl [vmem:[%s3270_s4] sm:$0x11 pattern:$0x75316420] }
 0x129   : > { %v623_v15 = vpop.f32.mrf.mxu0  ;;  %v1088_v5 = vcombine.high %v2269_v4, %v2269_v4  ;;  %v1095_v7 = vrot.slane %v2269_v4, %v3061_v14 }
 0x12a   : > { %v718_v17 = vadd.bf16 %v3072_v24, %v664_v12  ;;  %v665_v18 = vpack.c.bf16 %v623_v15, %v619_v8  ;;  %1012 = vmatprep.mubr.bf16.mxu1 %v749_v13 }
 0x12b   : > { %v627_v19 = vpop.f32.mrf.mxu0  ;;  %1013 = vmatmul.mubr.bf16.gmra.mxu1 %v748_v16  ;;  %v1102_v8 = vrot.slane %v1088_v5, %v3061_v14  ;;  %v1104_v9 = vpack.i.b16 %v1095_v7, %v1095_v7 }
 0x12c   : > { %v719_v21 = vadd.bf16 %v3075_v27, %v665_v18  ;;  %v734_v22 = vmul.bf16 1045249613, %v718_v17 }
 0x12d   : > { %v629_v23 = vpop.f32.mrf.mxu0  ;;  %v1111_v12 = vpack.i.b16 %v1102_v8, %v1102_v8  ;;  %v3117_v15 = vrot.slane %v1104_v9, %v3069_v20 }
 0x12e   : > { %v735_v25 = vmul.bf16 1045249613, %v719_v21  ;;  %v750_v31 = vmax.bf16 %v734_v22, %v718_v17 }
 0x12f   : > { %v631_v26 = vpop.f32.mrf.mxu0  ;;  %v3120_v18 = vrot.slane %v1111_v12, %v3069_v20 }
 0x130   : > { %v666_v28 = vpack.c.bf16 %v631_v26, %v627_v19  ;;  %v751_v29 = vmax.bf16 %v735_v25, %v719_v21  ;;  %v1197_v25 = vld [vmem:[%s3273_s7] sm:$0x3]  ;;  %v1205_v26 = vsub.s32 1, %v3049_v10 }
 0x131   : > { %v633_v30 = vpop.f32.mrf.mxu0 }
 0x132   : > { %v720_v32 = vadd.bf16 %v3072_v24, %v666_v28  ;;  %v667_v33 = vpack.c.bf16 %v633_v30, %v629_v23  ;;  %1022 = vmatprep.mubr.bf16.mxu1 %v751_v29 }
 0x133   : > { %v637_v34 = vpop.f32.mrf.mxu0  ;;  %1023 = vmatmul.mubr.bf16.gmra.mxu1 %v750_v31 }
 0x134   : > { %v721_v35 = vadd.bf16 %v3075_v27, %v667_v33  ;;  %v736_v36 = vmul.bf16 1045249613, %v720_v32  ;;  %v3129_v33 = vrot.slane %v1197_v25, %v3069_v20 }
 0x135   : > { %v639_v37 = vpop.f32.mrf.mxu0 }
 0x136   : > { %v737_v38 = vmul.bf16 1045249613, %v721_v35  ;;  %v752_v43 = vmax.bf16 %v736_v36, %v720_v32 }
 0x137   : > { %v641_v39 = vpop.f32.mrf.mxu0 }
 0x138   : > { %v668_v40 = vpack.c.bf16 %v641_v39, %v637_v34  ;;  %v753_v41 = vmax.bf16 %v737_v38, %v721_v35  ;;  %v3131_v35 = vrot.slane %v1197_v25, %v1205_v26 }
 0x139   : > { %v643_v42 = vpop.f32.mrf.mxu0 }
 0x13a   : > { %v722_v44 = vadd.bf16 %v3072_v24, %v668_v40  ;;  %v669_v45 = vpack.c.bf16 %v643_v42, %v639_v37  ;;  %1032 = vmatprep.mubr.bf16.mxu1 %v753_v41 }
 0x13b   : > { %v647_v46 = vpop.f32.mrf.mxu0  ;;  %1033 = vmatmul.mubr.bf16.gmra.mxu1 %v752_v43 }
 0x13c   : > { %v723_v47 = vadd.bf16 %v3075_v27, %v669_v45  ;;  %v738_v48 = vmul.bf16 1045249613, %v722_v44 }
 0x13d   : > { %v649_v49 = vpop.f32.mrf.mxu0 }
 0x13e   : > { %v739_v50 = vmul.bf16 1045249613, %v723_v47  ;;  %v754_v55 = vmax.bf16 %v738_v48, %v722_v44 }
 0x13f   : > { %v651_v51 = vpop.f32.mrf.mxu0 }
 0x140   : > { %v670_v52 = vpack.c.bf16 %v651_v51, %v647_v46  ;;  %v755_v53 = vmax.bf16 %v739_v50, %v723_v47 }
 0x141   : > { %v653_v54 = vpop.f32.mrf.mxu0 }
 0x142   : > { %v724_v56 = vadd.bf16 %v3072_v24, %v670_v52  ;;  %v671_v57 = vpack.c.bf16 %v653_v54, %v649_v49  ;;  %1042 = vmatprep.mubr.bf16.mxu1 %v755_v53  ;;  %v2571_v24 = vld [vmem:[%s3271_s5 + $0x94] ss:$8 sps:$4 sm:$0xff]  }
 0x143   : > { %1043 = vmatmul.mubr.bf16.gmra.mxu1 %v754_v55  ;;  %1532 = vmatprep.subr.bf16.mxu0 %v2571_v24 }
 0x144   : > { %v725_v58 = vadd.bf16 %v3075_v27, %v671_v57  ;;  %v740_v59 = vmul.bf16 1045249613, %v724_v56  ;;  %v2569_v27 = vld [vmem:[%s3271_s5 + $0x90] ss:$8 sps:$4 sm:$0xff]  }
 0x145   : > { %1533 = vmatpush2.bf16.msra.mxu0 %v2569_v27 }
 0x146   : > { %v741_v60 = vmul.bf16 1045249613, %v725_v58  ;;  %v756_v62 = vmax.bf16 %v740_v59, %v724_v56  ;;  %1534 = vmatprep.subr.bf16.mxu0 %v2574_v2 }
 0x148   : > { %v757_v61 = vmax.bf16 %v741_v60, %v725_v58 }
 0x149   : > { %1535 = vmatpush2.bf16.msra.mxu0 %v2572_v3 }
 0x14a   : > { %1052 = vmatprep.mubr.bf16.mxu1 %v757_v61 }
 0x14b   : > { %1053 = vmatmul.mubr.bf16.gmra.mxu1 %v756_v62 }
 0x1d3   : > { %v984_v11 = vpop.f32.mrf.mxu1 }
 0x1d5   : > { %v986_v13 = vpop.f32.mrf.mxu1 }
 0x1d7   : > { %v988_v16 = vpop.f32.mrf.mxu1 }
 0x1d8   : > { %v1063_v17 = vpack.c.bf16 %v988_v16, %v984_v11 }
 0x1d9   : > { %v990_v19 = vpop.f32.mrf.mxu1 }
 0x1da   : > { %v1117_v21 = vadd.bf16 %v3117_v15, %v1063_v17  ;;  %v1064_v22 = vpack.c.bf16 %v990_v19, %v986_v13 }
 0x1db   : > { %v994_v23 = vpop.f32.mrf.mxu1 }
 0x1dc   : > { %v1133_v28 = vmul.bf16 1045249613, %v1117_v21  ;;  %v1118_v29 = vadd.bf16 %v3120_v18, %v1064_v22 }
 0x1dd   : > { %v996_v30 = vpop.f32.mrf.mxu1 }
 0x1de   : > { %v1149_v31 = vmax.bf16 %v1133_v28, %v1117_v21  ;;  %v1134_v32 = vmul.bf16 1045249613, %v1118_v29 }
 0x1df   : > { %v998_v34 = vpop.f32.mrf.mxu1 }
 0x1e0   : > { %v1065_v36 = vpack.c.bf16 %v998_v34, %v994_v23  ;;  %v1150_v37 = vmax.bf16 %v1134_v32, %v1118_v29  ;;  %v1165_v38 = vunpack.c.l.bf16 %v1149_v31  ;;  %v1167_v43 = vunpack.c.h.bf16 %v1149_v31 }
 0x1e1   : > { %v1000_v39 = vpop.f32.mrf.mxu1 }
 0x1e2   : > { %v1119_v40 = vadd.bf16 %v3117_v15, %v1065_v36  ;;  %v1066_v41 = vpack.c.bf16 %v1000_v39, %v996_v30  ;;  %1536 = vmatprep.mubr.bf16.mxu0 %v1150_v37  ;;  %v1166_v10 = vunpack.c.l.bf16 %v1150_v37  ;;  %v1168_v44 = vunpack.c.h.bf16 %v1150_v37 }
 0x1e3   : > { %v1004_v42 = vpop.f32.mrf.mxu1  ;;  %1537 = vmatmul.mubr.bf16.vlgmr.msra.gmra.mxu0 %v1149_v31  ;;  %v1209_v47 = vmul.f32 %v3129_v33, %v1165_v38  ;;  %v1211_v57 = vmul.f32 %v3129_v33, %v1167_v43 }
 0x1e4   : > { %v1135_v45 = vmul.bf16 1045249613, %v1119_v40  ;;  %v1120_v46 = vadd.bf16 %v3120_v18, %v1066_v41  ;;  %v1210_v48 = vmul.f32 %v3131_v35, %v1166_v10  ;;  %v1212_v53 = vmul.f32 %v3131_v35, %v1168_v44 }
 0x1e5   : > { %v1006_v49 = vpop.f32.mrf.mxu1 }
 0x1e6   : > { %v1136_v50 = vmul.bf16 1045249613, %v1120_v46  ;;  %v1241_v51 = vadd.f32 %v1210_v48, %v1209_v47  ;;  %v1151_v52 = vmax.bf16 %v1135_v45, %v1119_v40  ;;  %v1244_v62 = vadd.f32 %v1212_v53, %v1211_v57 }
 0x1e7   : > { %v1008_v54 = vpop.f32.mrf.mxu1 }
 0x1e8   : > { %v1067_v55 = vpack.c.bf16 %v1008_v54, %v1004_v42  ;;  %1242 = vadd.xlane.f32.xlu0 %v1241_v51  ;;  %v1152_v56 = vmax.bf16 %v1136_v50, %v1120_v46  ;;  %v1169_v58 = vunpack.c.l.bf16 %v1151_v52  ;;  %v1171_v24 = vunpack.c.h.bf16 %v1151_v52 }
 0x1e9   : > { %v1010_v59 = vpop.f32.mrf.mxu1 }
 0x1ea   : > { %v1121_v60 = vadd.bf16 %v3117_v15, %v1067_v55  ;;  %v1068_v61 = vpack.c.bf16 %v1010_v59, %v1006_v49  ;;  %1546 = vmatprep.mubr.bf16.mxu0 %v1152_v56  ;;  %v1170_v63 = vunpack.c.l.bf16 %v1152_v56  ;;  %v1172_v27 = vunpack.c.h.bf16 %v1152_v56 }
 0x1eb   : > { %v1014_v0 = vpop.f32.mrf.mxu1  ;;  %1547 = vmatmul.mubr.bf16.gmra.mxu0 %v1151_v52  ;;  %v1213_v4 = vmul.f32 %v3129_v33, %v1169_v58  ;;  %v1215_v19 = vmul.f32 %v3129_v33, %v1171_v24 }
 0x1ec   : > { %v1137_v2 = vmul.bf16 1045249613, %v1121_v60  ;;  %v1122_v3 = vadd.bf16 %v3120_v18, %v1068_v61  ;;  %1245 = vadd.xlane.f32.xlu0 %v1244_v62  ;;  %v1214_v5 = vmul.f32 %v3131_v35, %v1170_v63  ;;  %v1216_v12 = vmul.f32 %v3131_v35, %v1172_v27 }
 0x1ed   : > { %v1016_v7 = vpop.f32.mrf.mxu1 }
 0x1ee   : > { %v1138_v8 = vmul.bf16 1045249613, %v1122_v3  ;;  %v1247_v9 = vadd.f32 %v1214_v5, %v1213_v4  ;;  %v1153_v11 = vmax.bf16 %v1137_v2, %v1121_v60  ;;  %v1250_v28 = vadd.f32 %v1216_v12, %v1215_v19 }
 0x1ef   : > { %v1018_v13 = vpop.f32.mrf.mxu1 }
 0x1f0   : > { %v1069_v16 = vpack.c.bf16 %v1018_v13, %v1014_v0  ;;  %1248 = vadd.xlane.f32.xlu1 %v1247_v9  ;;  %v1154_v17 = vmax.bf16 %v1138_v8, %v1122_v3  ;;  %v1175_v21 = vunpack.c.h.bf16 %v1153_v11  ;;  %v1173_v23 = vunpack.c.l.bf16 %v1153_v11 }
 0x1f1   : > { %v1020_v22 = vpop.f32.mrf.mxu1 }
 0x1f2   : > { %v1123_v25 = vadd.bf16 %v3117_v15, %v1069_v16  ;;  %v1070_v26 = vpack.c.bf16 %v1020_v22, %v1016_v7  ;;  %1556 = vmatprep.mubr.bf16.mxu0 %v1154_v17  ;;  %v1176_v29 = vunpack.c.h.bf16 %v1154_v17  ;;  %v1174_v31 = vunpack.c.l.bf16 %v1154_v17 }
 0x1f3   : > { %v1024_v30 = vpop.f32.mrf.mxu1  ;;  %1557 = vmatmul.mubr.bf16.gmra.mxu0 %v1153_v11  ;;  %v1219_v36 = vmul.f32 %v3129_v33, %v1175_v21  ;;  %v1217_v39 = vmul.f32 %v3129_v33, %v1173_v23 }
 0x1f4   : > { %v1139_v32 = vmul.bf16 1045249613, %v1123_v25  ;;  %v1124_v34 = vadd.bf16 %v3120_v18, %v1070_v26  ;;  %1251 = vadd.xlane.f32.xlu1 %v1250_v28  ;;  %v1220_v37 = vmul.f32 %v3131_v35, %v1176_v29  ;;  %v1218_v40 = vmul.f32 %v3131_v35, %v1174_v31 }
 0x1f5   : > { %v1026_v38 = vpop.f32.mrf.mxu1 }
 0x1f6   : > { %v1140_v41 = vmul.bf16 1045249613, %v1124_v34  ;;  %v1256_v10 = vadd.f32 %v1220_v37, %v1219_v36  ;;  %v1155_v42 = vmax.bf16 %v1139_v32, %v1123_v25  ;;  %v1253_v44 = vadd.f32 %v1218_v40, %v1217_v39 }
 0x1f7   : > { %v1028_v43 = vpop.f32.mrf.mxu1 }
 0x1f8   : > { %v1071_v45 = vpack.c.bf16 %v1028_v43, %v1024_v30  ;;  %1257 = vadd.xlane.f32.xlu1 %v1256_v10  ;;  %v1156_v46 = vmax.bf16 %v1140_v41, %v1124_v34  ;;  %v1179_v47 = vunpack.c.h.bf16 %v1155_v42  ;;  %1254 = vadd.xlane.f32.xlu0 %v1253_v44  ;;  %v1177_v49 = vunpack.c.l.bf16 %v1155_v42 }
 0x1f9   : > { %v1030_v48 = vpop.f32.mrf.mxu1 }
 0x1fa   : > { %v1125_v50 = vadd.bf16 %v3117_v15, %v1071_v45  ;;  %v1072_v51 = vpack.c.bf16 %v1030_v48, %v1026_v38  ;;  %1566 = vmatprep.mubr.bf16.mxu0 %v1156_v46  ;;  %v1180_v52 = vunpack.c.h.bf16 %v1156_v46  ;;  %v1178_v54 = vunpack.c.l.bf16 %v1156_v46 }
 0x1fb   : > { %v1034_v53 = vpop.f32.mrf.mxu1  ;;  %1567 = vmatmul.mubr.bf16.gmra.mxu0 %v1155_v42  ;;  %v1223_v57 = vmul.f32 %v3129_v33, %v1179_v47  ;;  %v1221_v60 = vmul.f32 %v3129_v33, %v1177_v49 }
 0x1fc   : > { %v1141_v55 = vmul.bf16 1045249613, %v1125_v50  ;;  %v1126_v56 = vadd.bf16 %v3120_v18, %v1072_v51  ;;  %v1224_v58 = vmul.f32 %v3131_v35, %v1180_v52  ;;  %v1222_v61 = vmul.f32 %v3131_v35, %v1178_v54  ;;  %v2576_v51 = vld [vmem:[#allocation5 + $0x38] sm:$0xff]  }
 0x1fd   : > { %v1036_v59 = vpop.f32.mrf.mxu1 }
 0x1fe   : > { %v1142_v62 = vmul.bf16 1045249613, %v1126_v56  ;;  %v1262_v63 = vadd.f32 %v1224_v58, %v1223_v57  ;;  %v1157_v0 = vmax.bf16 %v1141_v55, %v1125_v50  ;;  %v1259_v27 = vadd.f32 %v1222_v61, %v1221_v60  ;;  %v2575_v50 = vld [vmem:[#allocation5 + $0x78] sm:$0xff]  }
 0x1ff   : > { %v1038_v24 = vpop.f32.mrf.mxu1  ;;  %2402 = vmatprep.subr.bf16.mxu1 %v2575_v50  ;;  %2338 = vmatprep.subr.bf16.mxu0 %v2575_v50 }
 0x200   : > { %v1073_v2 = vpack.c.bf16 %v1038_v24, %v1034_v53  ;;  %1263 = vadd.xlane.f32.xlu1 %v1262_v63  ;;  %v1158_v3 = vmax.bf16 %v1142_v62, %v1126_v56  ;;  %v1183_v4 = vunpack.c.h.bf16 %v1157_v0  ;;  %1260 = vadd.xlane.f32.xlu0 %v1259_v27  ;;  %v1181_v7 = vunpack.c.l.bf16 %v1157_v0 }
 0x201   : > { %v1040_v5 = vpop.f32.mrf.mxu1  ;;  %2410 = vmatpush3.bf16.msra.mxu1 %v2576_v51  ;;  %2339 = vmatpush3.bf16.msra.mxu0 %v2576_v51 }
 0x202   : > { %v1127_v8 = vadd.bf16 %v3117_v15, %v1073_v2  ;;  %v1074_v9 = vpack.c.bf16 %v1040_v5, %v1036_v59  ;;  %1576 = vmatprep.mubr.bf16.mxu0 %v1158_v3  ;;  %v1184_v11 = vunpack.c.h.bf16 %v1158_v3  ;;  %v1182_v13 = vunpack.c.l.bf16 %v1158_v3 }
 0x203   : > { %v1044_v12 = vpop.f32.mrf.mxu1  ;;  %1577 = vmatmul.mubr.bf16.gmra.mxu0 %v1157_v0  ;;  %v1227_v19 = vmul.f32 %v3129_v33, %v1183_v4  ;;  %v1225_v23 = vmul.f32 %v3129_v33, %v1181_v7 }
 0x204   : > { %v1143_v16 = vmul.bf16 1045249613, %v1127_v8  ;;  %v1128_v17 = vadd.bf16 %v3120_v18, %v1074_v9  ;;  %v1228_v21 = vmul.f32 %v3131_v35, %v1184_v11  ;;  %v1226_v25 = vmul.f32 %v3131_v35, %v1182_v13  ;;  %v2578_v9 = vld [vmem:[#allocation5 + $0x30] sm:$0xff]  }
 0x205   : > { %v1046_v22 = vpop.f32.mrf.mxu1 }
 0x206   : > { %v1144_v26 = vmul.bf16 1045249613, %v1128_v17  ;;  %v1268_v28 = vadd.f32 %v1228_v21, %v1227_v19  ;;  %v1159_v29 = vmax.bf16 %v1143_v16, %v1127_v8  ;;  %v1265_v31 = vadd.f32 %v1226_v25, %v1225_v23  ;;  %v2577_v8 = vld [vmem:[#allocation5 + $0x70] sm:$0xff]   ;;  %v2580_v25 = vld [vmem:[#allocation5 + $0x28] sm:$0xff]  }
 0x207   : > { %v1048_v30 = vpop.f32.mrf.mxu1  ;;  %2403 = vmatprep.subr.bf16.mxu1 %v2577_v8  ;;  %2340 = vmatprep.subr.bf16.mxu0 %v2577_v8 }
 0x208   : > { %v1075_v32 = vpack.c.bf16 %v1048_v30, %v1044_v12  ;;  %1269 = vadd.xlane.f32.xlu1 %v1268_v28  ;;  %v1160_v34 = vmax.bf16 %v1144_v26, %v1128_v17  ;;  %v1187_v36 = vunpack.c.h.bf16 %v1159_v29  ;;  %1266 = vadd.xlane.f32.xlu0 %v1265_v31  ;;  %v1185_v38 = vunpack.c.l.bf16 %v1159_v29 }
 0x209   : > { %v1050_v37 = vpop.f32.mrf.mxu1  ;;  %2411 = vmatpush3.bf16.msra.mxu1 %v2578_v9  ;;  %2341 = vmatpush3.bf16.msra.mxu0 %v2578_v9 }
 0x20a   : > { %v1129_v39 = vadd.bf16 %v3117_v15, %v1075_v32  ;;  %v1076_v40 = vpack.c.bf16 %v1050_v37, %v1046_v22  ;;  %1586 = vmatprep.mubr.bf16.mxu0 %v1160_v34  ;;  %v1188_v41 = vunpack.c.h.bf16 %v1160_v34  ;;  %v1186_v42 = vunpack.c.l.bf16 %v1160_v34  ;;  %v2579_v22 = vld [vmem:[#allocation5 + $0x68] sm:$0xff]   ;;  %v2581_v32 = vld [vmem:[#allocation5 + $0x60] sm:$0xff]   ;;  %v2584_v37 = vld [vmem:[#allocation5 + $0x18] sm:$0xff]  }
 0x20b   : > { %v1054_v10 = vpop.f32.mrf.mxu1  ;;  %1587 = vmatmul.mubr.bf16.gmra.mxu0 %v1159_v29  ;;  %v1231_v45 = vmul.f32 %v3129_v33, %v1187_v36  ;;  %v1229_v48 = vmul.f32 %v3129_v33, %v1185_v38  ;;  %2404 = vmatprep.subr.bf16.mxu1 %v2579_v22  ;;  %v2582_v34 = vld [vmem:[#allocation5 + $0x20] sm:$0xff]   ;;  %v2583_v36 = vld [vmem:[#allocation5 + $0x58] sm:$0xff]   ;;  %v2587_v38 = vld [vmem:[#allocation5 + $0x48] sm:$0xff]  }
 0x20c   : > { %v1145_v43 = vmul.bf16 1045249613, %v1129_v39  ;;  %v1130_v44 = vadd.bf16 %v3120_v18, %v1076_v40  ;;  %v1232_v46 = vmul.f32 %v3131_v35, %v1188_v41  ;;  %v1230_v49 = vmul.f32 %v3131_v35, %v1186_v42  ;;  %2342 = vmatprep.subr.bf16.mxu0 %v2579_v22  ;;  %v2589_v40 = vld [vmem:[#allocation5 + $0x40] sm:$0xff]   ;;  %v2270_v42 = vld [vmem:[#allocation2] ss:$0 sm:$0xff] }
 0x20d   : > { %v1056_v47 = vpop.f32.mrf.mxu1  ;;  %2412 = vmatpush3.bf16.msra.mxu1 %v2580_v25  ;;  %2343 = vmatpush3.bf16.msra.mxu0 %v2580_v25  ;;  %v2590_v41 = vld [vmem:[#allocation5] sm:$0xff]  }
 0x20e   : > { %v1146_v52 = vmul.bf16 1045249613, %v1130_v44  ;;  %v1274_v53 = vadd.f32 %v1232_v46, %v1231_v45  ;;  %v1161_v54 = vmax.bf16 %v1145_v43, %v1129_v39  ;;  %v1271_v56 = vadd.f32 %v1230_v49, %v1229_v48  ;;  %2344 = vmatprep.subr.bf16.mxu0 %v2581_v32  ;;  %2405 = vmatprep.subr.bf16.mxu1 %v2581_v32  ;;  %v2588_v39 = vld [vmem:[#allocation5 + $0x8] sm:$0xff]  }
 0x20f   : > { %v1058_v55 = vpop.f32.mrf.mxu1 }
 0x210   : > { %v1077_v57 = vpack.c.bf16 %v1058_v55, %v1054_v10  ;;  %1275 = vadd.xlane.f32.xlu1 %v1274_v53  ;;  %v1162_v58 = vmax.bf16 %v1146_v52, %v1130_v44  ;;  %v1191_v59 = vunpack.c.h.bf16 %v1161_v54  ;;  %1272 = vadd.xlane.f32.xlu0 %v1271_v56  ;;  %v1189_v61 = vunpack.c.l.bf16 %v1161_v54 }
 0x211   : > { %v1060_v60 = vpop.f32.mrf.mxu1  ;;  %2345 = vmatpush3.bf16.msra.mxu0 %v2582_v34  ;;  %2413 = vmatpush3.bf16.msra.mxu1 %v2582_v34 }
 0x212   : > { %v1131_v62 = vadd.bf16 %v3117_v15, %v1077_v57  ;;  %v1078_v63 = vpack.c.bf16 %v1060_v60, %v1056_v47  ;;  %1596 = vmatprep.mubr.bf16.mxu0 %v1162_v58  ;;  %v1192_v0 = vunpack.c.h.bf16 %v1162_v58  ;;  %v1190_v24 = vunpack.c.l.bf16 %v1162_v58  ;;  %2346 = vmatprep.subr.bf16.mxu0 %v2583_v36 }
 0x213   : > { %1597 = vmatmul.mubr.bf16.gmra.mxu0 %v1161_v54  ;;  %v1235_v3 = vmul.f32 %v3129_v33, %v1191_v59  ;;  %v1233_v5 = vmul.f32 %v3129_v33, %v1189_v61  ;;  %2406 = vmatprep.subr.bf16.mxu1 %v2583_v36 }
 0x214   : > { %v1147_v27 = vmul.bf16 1045249613, %v1131_v62  ;;  %v1132_v2 = vadd.bf16 %v3120_v18, %v1078_v63  ;;  %v1236_v4 = vmul.f32 %v3131_v35, %v1192_v0  ;;  %v1234_v7 = vmul.f32 %v3131_v35, %v1190_v24 }
 0x215   : > { %2347 = vmatpush3.bf16.msra.mxu0 %v2584_v37  ;;  %2414 = vmatpush3.bf16.msra.mxu1 %v2584_v37 }
 0x216   : > { %v1148_v11 = vmul.bf16 1045249613, %v1132_v2  ;;  %v1280_v15 = vadd.f32 %v1236_v4, %v1235_v3  ;;  %v1163_v12 = vmax.bf16 %v1147_v27, %v1131_v62  ;;  %v1277_v13 = vadd.f32 %v1234_v7, %v1233_v5  ;;  %v2303_v3 = vld.sshfl [vmem:[%s3272_s6] sm:$0x11 pattern:$0x75316420] }
 0x217   : > { %v1642_v8 = vcombine.high %v2303_v3, %v2303_v3 }
 0x218   : > { %1281 = vadd.xlane.f32.xlu1 %v1280_v15  ;;  %v1164_v16 = vmax.bf16 %v1148_v11, %v1132_v2  ;;  %v1195_v17 = vunpack.c.h.bf16 %v1163_v12  ;;  %v1193_v18 = vunpack.c.l.bf16 %v1163_v12  ;;  %1278 = vadd.xlane.f32.xlu0 %v1277_v13  ;;  %v1649_v11 = vrot.slane %v2303_v3, %v3061_v14 }
 0x219   : > { %v1656_v15 = vrot.slane %v1642_v8, %v3061_v14 }
 0x21a   : > { %1606 = vmatprep.mubr.bf16.mxu0 %v1164_v16  ;;  %v1196_v19 = vunpack.c.h.bf16 %v1164_v16  ;;  %v1194_v21 = vunpack.c.l.bf16 %v1164_v16  ;;  %v1239_v23 = vmul.f32 %v3129_v33, %v1195_v17  ;;  %v1237_v28 = vmul.f32 %v3129_v33, %v1193_v18  ;;  %v2585_v33 = vld [vmem:[#allocation5 + $0x50] sm:$0xff]  }
 0x21b   : > { %1607 = vmatmul.mubr.bf16.gmra.mxu0 %v1163_v12  ;;  %2348 = vmatprep.subr.bf16.mxu0 %v2585_v33  ;;  %v1658_v17 = vpack.i.b16 %v1649_v11, %v1649_v11 }
 0x21c   : > { %v1240_v26 = vmul.f32 %v3131_v35, %v1196_v19  ;;  %v1238_v29 = vmul.f32 %v3131_v35, %v1194_v21  ;;  %v2586_v35 = vld [vmem:[#allocation5 + $0x10] sm:$0xff]   ;;  %2407 = vmatprep.subr.bf16.mxu1 %v2585_v33  ;;  %v1665_v21 = vpack.i.b16 %v1656_v15, %v1656_v15 }
 0x21d   : > { %2349 = vmatpush3.bf16.msra.mxu0 %v2586_v35  ;;  %2415 = vmatpush3.bf16.msra.mxu1 %v2586_v35  ;;  %v3185_v25 = vrot.slane %v1658_v17, %v3069_v20 }
 0x21e   : > { %v1286_v30 = vadd.f32 %v1240_v26, %v1239_v23  ;;  %v1283_v31 = vadd.f32 %v1238_v29, %v1237_v28  ;;  %2350 = vmatprep.subr.bf16.mxu0 %v2587_v38  ;;  %2408 = vmatprep.subr.bf16.mxu1 %v2587_v38  ;;  %v3188_v29 = vrot.slane %v1665_v21, %v3069_v20 }
 0x220   : > { %1287 = vadd.xlane.f32.xlu1 %v1286_v30  ;;  %1284 = vadd.xlane.f32.xlu0 %v1283_v31 }
 0x221   : > { %2351 = vmatpush3.bf16.msra.mxu0 %v2588_v39  ;;  %2416 = vmatpush3.bf16.msra.mxu1 %v2588_v39 }
 0x222   : > { %2352 = vmatprep.subr.bf16.mxu0 %v2589_v40  ;;  %2409 = vmatprep.subr.bf16.mxu1 %v2589_v40 }
 0x225   : > { %2353 = vmatpush3.bf16.msra.mxu0 %v2590_v41  ;;  %2417 = vmatpush3.bf16.msra.mxu1 %v2590_v41 }
 0x271   : > { %v1243_v10 = vpop.xlane.xlu0 %1242 }
 0x272   : > { %v1296_v44 = vadd.f32 %v2270_v42, %v1243_v10 }
 0x275   : > { %v1246_v43 = vpop.xlane.xlu0 %1245 }
 0x276   : > { %v1297_v45 = vadd.f32 %v2270_v42, %v1246_v43 }
 0x278   : > { %v1979_v46 = vpack.c.bf16 %v1297_v45, %v1296_v44 }
 0x279   : > { %v1249_v47 = vpop.xlane.xlu1 %1248 }
 0x27a   : > { %1989 = vperm.xlu0 %2463, %v1979_v46   ;;  %v1298_v49 = vadd.f32 %v2270_v42, %v1249_v47 }
 0x27d   : > { %v1252_v48 = vpop.xlane.xlu1 %1251 }
 0x27e   : > { %v1299_v50 = vadd.f32 %v2270_v42, %v1252_v48 }
 0x280   : > { %v1980_v51 = vpack.c.bf16 %v1299_v50, %v1298_v49 }
 0x281   : > { %v1258_v52 = vpop.xlane.xlu1 %1257  ;;  %v1255_v54 = vpop.xlane.xlu0 %1254 }
 0x282   : > { %v1301_v53 = vadd.f32 %v2270_v42, %v1258_v52  ;;  %1994 = vperm.xlu1 %2464, %v1980_v51   ;;  %v1300_v55 = vadd.f32 %v2270_v42, %v1255_v54 }
 0x284   : > { %v1981_v56 = vpack.c.bf16 %v1301_v53, %v1300_v55 }
 0x286   : > { %1999 = vperm.xlu1 %2464, %v1981_v56  }
 0x289   : > { %v1264_v57 = vpop.xlane.xlu1 %1263  ;;  %v1261_v59 = vpop.xlane.xlu0 %1260 }
 0x28a   : > { %v1303_v58 = vadd.f32 %v2270_v42, %v1264_v57  ;;  %v1302_v60 = vadd.f32 %v2270_v42, %v1261_v59 }
 0x28c   : > { %v1982_v61 = vpack.c.bf16 %v1303_v58, %v1302_v60 }
 0x28e   : > { %2004 = vperm.xlu1 %2464, %v1982_v61  }
 0x291   : > { %v1270_v62 = vpop.xlane.xlu1 %1269  ;;  %v1267_v0 = vpop.xlane.xlu0 %1266 }
 0x292   : > { %v1305_v63 = vadd.f32 %v2270_v42, %v1270_v62  ;;  %v1304_v24 = vadd.f32 %v2270_v42, %v1267_v0 }
 0x294   : > { %v1983_v27 = vpack.c.bf16 %v1305_v63, %v1304_v24 }
 0x296   : > { %2009 = vperm.xlu1 %2464, %v1983_v27  }
 0x299   : > { %v1276_v2 = vpop.xlane.xlu1 %1275  ;;  %v1273_v5 = vpop.xlane.xlu0 %1272 }
 0x29a   : > { %v1307_v4 = vadd.f32 %v2270_v42, %v1276_v2  ;;  %v1306_v7 = vadd.f32 %v2270_v42, %v1273_v5 }
 0x29c   : > { %v1984_v9 = vpack.c.bf16 %v1307_v4, %v1306_v7 }
 0x29e   : > { %2014 = vperm.xlu1 %2464, %v1984_v9  }
 0x2a1   : > { %v1282_v12 = vpop.xlane.xlu1 %1281  ;;  %v1279_v16 = vpop.xlane.xlu0 %1278 }
 0x2a2   : > { %v1309_v13 = vadd.f32 %v2270_v42, %v1282_v12  ;;  %v1308_v18 = vadd.f32 %v2270_v42, %v1279_v16 }
 0x2a3   : > { %v1538_v19 = vpop.f32.mrf.mxu0 }
 0x2a4   : > { %v1985_v22 = vpack.c.bf16 %v1309_v13, %v1308_v18 }
 0x2a5   : > { %v1540_v23 = vpop.f32.mrf.mxu0 }
 0x2a6   : > { %2019 = vperm.xlu1 %2464, %v1985_v22  }
 0x2a7   : > { %v1542_v26 = vpop.f32.mrf.mxu0 }
 0x2a8   : > { %v1617_v28 = vpack.c.bf16 %v1542_v26, %v1538_v19 }
 0x2a9   : > { %v1544_v30 = vpop.f32.mrf.mxu0  ;;  %v1288_v14 = vpop.xlane.xlu1 %1287 }
 0x2aa   : > { %v1671_v31 = vadd.bf16 %v3185_v25, %v1617_v28  ;;  %v1618_v32 = vpack.c.bf16 %v1544_v30, %v1540_v23  ;;  %v1311_v34 = vadd.f32 %v2270_v42, %v1288_v14  ;;  %v1285_v36 = vpop.xlane.xlu0 %1284 }
 0x2ab   : > { %v1310_v37 = vadd.f32 %v2270_v42, %v1285_v36  ;;  %v1548_v33 = vpop.f32.mrf.mxu0 }
 0x2ac   : > { %v1672_v35 = vadd.bf16 %v3188_v29, %v1618_v32  ;;  %v1687_v38 = vmul.bf16 1045249613, %v1671_v31 }
 0x2ad   : > { %v1986_v39 = vpack.c.bf16 %v1311_v34, %v1310_v37  ;;  %v1550_v40 = vpop.f32.mrf.mxu0 }
 0x2ae   : > { %v1688_v41 = vmul.bf16 1045249613, %v1672_v35  ;;  %v1703_v45 = vmax.bf16 %v1687_v38, %v1671_v31 }
 0x2af   : > { %2024 = vperm.xlu1 %2464, %v1986_v39   ;;  %v1552_v10 = vpop.f32.mrf.mxu0 }
 0x2b0   : > { %v1619_v43 = vpack.c.bf16 %v1552_v10, %v1548_v33  ;;  %v1704_v44 = vmax.bf16 %v1688_v41, %v1672_v35 }
 0x2b1   : > { %v1554_v46 = vpop.f32.mrf.mxu0 }
 0x2b2   : > { %v1673_v47 = vadd.bf16 %v3185_v25, %v1619_v43  ;;  %v1620_v48 = vpack.c.bf16 %v1554_v46, %v1550_v40  ;;  %1879 = vmatprep.mubr.bf16.mxu0 %v1704_v44 }
 0x2b3   : > { %v1558_v49 = vpop.f32.mrf.mxu0  ;;  %1880 = vmatmul.mubr.bf16.vlgmr.msra.gmra.mxu0 %v1703_v45 }
 0x2b4   : > { %v1674_v42 = vadd.bf16 %v3188_v29, %v1620_v48  ;;  %v1689_v50 = vmul.bf16 1045249613, %v1673_v47 }
 0x2b5   : > { %v1560_v51 = vpop.f32.mrf.mxu0 }
 0x2b6   : > { %v1690_v52 = vmul.bf16 1045249613, %v1674_v42  ;;  %v1705_v57 = vmax.bf16 %v1689_v50, %v1673_v47 }
 0x2b7   : > { %v1562_v53 = vpop.f32.mrf.mxu0 }
 0x2b8   : > { %v1621_v54 = vpack.c.bf16 %v1562_v53, %v1558_v49  ;;  %v1706_v55 = vmax.bf16 %v1690_v52, %v1674_v42 }
 0x2b9   : > { %v1564_v56 = vpop.f32.mrf.mxu0 }
 0x2ba   : > { %v1675_v58 = vadd.bf16 %v3185_v25, %v1621_v54  ;;  %v1622_v59 = vpack.c.bf16 %v1564_v56, %v1560_v51  ;;  %1887 = vmatprep.mubr.bf16.mxu0 %v1706_v55 }
 0x2bb   : > { %v1568_v60 = vpop.f32.mrf.mxu0  ;;  %1888 = vmatmul.mubr.bf16.gmra.mxu0 %v1705_v57 }
 0x2bc   : > { %v1676_v61 = vadd.bf16 %v3188_v29, %v1622_v59  ;;  %v1691_v62 = vmul.bf16 1045249613, %v1675_v58 }
 0x2bd   : > { %v1570_v63 = vpop.f32.mrf.mxu0 }
 0x2be   : > { %v1692_v0 = vmul.bf16 1045249613, %v1676_v61  ;;  %v1707_v4 = vmax.bf16 %v1691_v62, %v1675_v58 }
 0x2bf   : > { %v1572_v24 = vpop.f32.mrf.mxu0 }
 0x2c0   : > { %v1623_v27 = vpack.c.bf16 %v1572_v24, %v1568_v60  ;;  %v1708_v2 = vmax.bf16 %v1692_v0, %v1676_v61 }
 0x2c1   : > { %v1574_v3 = vpop.f32.mrf.mxu0 }
 0x2c2   : > { %v1677_v5 = vadd.bf16 %v3185_v25, %v1623_v27  ;;  %v1624_v7 = vpack.c.bf16 %v1574_v3, %v1570_v63  ;;  %1895 = vmatprep.mubr.bf16.mxu0 %v1708_v2  ;;  %v1952_v2 = vld [vmem:[#allocation7] sm:$0x1] }
 0x2c3   : > { %v1578_v8 = vpop.f32.mrf.mxu0  ;;  %1896 = vmatmul.mubr.bf16.gmra.mxu0 %v1707_v4  ;;  %v1954_v4 = vpack.i.b16 %v1952_v2, %v1952_v2 }
 0x2c4   : > { %v1678_v9 = vadd.bf16 %v3188_v29, %v1624_v7  ;;  %v1693_v11 = vmul.bf16 1045249613, %v1677_v5 }
 0x2c5   : > { %v1580_v15 = vpop.f32.mrf.mxu0 }
 0x2c6   : > { %v1694_v12 = vmul.bf16 1045249613, %v1678_v9  ;;  %v1709_v18 = vmax.bf16 %v1693_v11, %v1677_v5  ;;  %v1977_v11 = vand.u32 127, %v685_v6 }
 0x2c7   : > { %v1582_v13 = vpop.f32.mrf.mxu0 }
 0x2c8   : > { %v1625_v16 = vpack.c.bf16 %v1582_v13, %v1578_v8  ;;  %v1710_v17 = vmax.bf16 %v1694_v12, %v1678_v9  ;;  %vm1978_vm1 = vcmp.eq.s32.totalorder %v1977_v11, 64 }
 0x2c9   : > { %v1584_v19 = vpop.f32.mrf.mxu0  ;;  %vm2027_vm2 = vmpackc.low %vm1978_vm1, %vm1978_vm1 }
 0x2ca   : > { %v1679_v21 = vadd.bf16 %v3185_v25, %v1625_v16  ;;  %v1626_v22 = vpack.c.bf16 %v1584_v19, %v1580_v15  ;;  %1903 = vmatprep.mubr.bf16.mxu1 %v1710_v17 }
 0x2cb   : > { %v1588_v23 = vpop.f32.mrf.mxu0  ;;  %1904 = vmatmul.mubr.bf16.vlgmr.msra.gmra.mxu1 %v1709_v18 }
 0x2cc   : > { %v1680_v26 = vadd.bf16 %v3188_v29, %v1626_v22  ;;  %v1695_v28 = vmul.bf16 1045249613, %v1679_v21 }
 0x2cd   : > { %v1590_v30 = vpop.f32.mrf.mxu0 }
 0x2ce   : > { %v1696_v14 = vmul.bf16 1045249613, %v1680_v26  ;;  %v1711_v37 = vmax.bf16 %v1695_v28, %v1679_v21 }
 0x2cf   : > { %v1592_v31 = vpop.f32.mrf.mxu0 }
 0x2d0   : > { %v1627_v32 = vpack.c.bf16 %v1592_v31, %v1588_v23  ;;  %v1712_v34 = vmax.bf16 %v1696_v14, %v1680_v26  ;;  %v2028_v23 = vsel %vm2027_vm2, 65537, %v2708_v1 }
 0x2d1   : > { %v1594_v36 = vpop.f32.mrf.mxu0 }
 0x2d2   : > { %v1681_v33 = vadd.bf16 %v3185_v25, %v1627_v32  ;;  %v1628_v35 = vpack.c.bf16 %v1594_v36, %v1590_v30  ;;  %1911 = vmatprep.mubr.bf16.mxu1 %v1712_v34  ;;  %v2032_v30 = vrot.slane %v2028_v23, %v3069_v20 }
 0x2d3   : > { %v1598_v38 = vpop.f32.mrf.mxu0  ;;  %1912 = vmatmul.mubr.bf16.gmra.mxu1 %v1711_v37 }
 0x2d4   : > { %v1682_v39 = vadd.bf16 %v3188_v29, %v1628_v35  ;;  %v1697_v40 = vmul.bf16 1045249613, %v1681_v33  ;;  %vm3214_vm3 = vcmp.ne.s16.totalorder %v2032_v30, 0 }
 0x2d5   : > { %v1600_v41 = vpop.f32.mrf.mxu0 }
 0x2d6   : > { %v1698_v10 = vmul.bf16 1045249613, %v1682_v39  ;;  %v1713_v47 = vmax.bf16 %v1697_v40, %v1681_v33 }
 0x2d7   : > { %v1602_v43 = vpop.f32.mrf.mxu0 }
 0x2d8   : > { %v1629_v44 = vpack.c.bf16 %v1602_v43, %v1598_v38  ;;  %v1714_v45 = vmax.bf16 %v1698_v10, %v1682_v39 }
 0x2d9   : > { %v1604_v46 = vpop.f32.mrf.mxu0 }
 0x2da   : > { %v1683_v48 = vadd.bf16 %v3185_v25, %v1629_v44  ;;  %v1630_v49 = vpack.c.bf16 %v1604_v46, %v1600_v41  ;;  %1919 = vmatprep.mubr.bf16.mxu1 %v1714_v45 }
 0x2db   : > { %v1608_v42 = vpop.f32.mrf.mxu0  ;;  %1920 = vmatmul.mubr.bf16.gmra.mxu1 %v1713_v47 }
 0x2dc   : > { %v1684_v50 = vadd.bf16 %v3188_v29, %v1630_v49  ;;  %v1699_v51 = vmul.bf16 1045249613, %v1683_v48 }
 0x2dd   : > { %v1610_v52 = vpop.f32.mrf.mxu0 }
 0x2de   : > { %v1700_v53 = vmul.bf16 1045249613, %v1684_v50  ;;  %v1715_v58 = vmax.bf16 %v1699_v51, %v1683_v48 }
 0x2df   : > { %v1612_v54 = vpop.f32.mrf.mxu0 }
 0x2e0   : > { %v1631_v55 = vpack.c.bf16 %v1612_v54, %v1608_v42  ;;  %v1716_v56 = vmax.bf16 %v1700_v53, %v1684_v50 }
 0x2e1   : > { %v1614_v57 = vpop.f32.mrf.mxu0 }
 0x2e2   : > { %v1685_v59 = vadd.bf16 %v3185_v25, %v1631_v55  ;;  %v1632_v60 = vpack.c.bf16 %v1614_v57, %v1610_v52  ;;  %1927 = vmatprep.mubr.bf16.mxu1 %v1716_v56  ;;  %v3207_v25 = vrot.slane %v1954_v4, %v3069_v20 }
 0x2e3   : > { %1928 = vmatmul.mubr.bf16.gmra.mxu1 %v1715_v58 }
 0x2e4   : > { %v1686_v61 = vadd.bf16 %v3188_v29, %v1632_v60  ;;  %v1701_v62 = vmul.bf16 1045249613, %v1685_v59 }
 0x2e6   : > { %v1702_v63 = vmul.bf16 1045249613, %v1686_v61  ;;  %v1717_v24 = vmax.bf16 %v1701_v62, %v1685_v59 }
 0x2e8   : > { %v1718_v0 = vmax.bf16 %v1702_v63, %v1686_v61 }
 0x2ea   : > { %1935 = vmatprep.mubr.bf16.mxu1 %v1718_v0 }
 0x2eb   : > { %1936 = vmatmul.mubr.bf16.gmra.mxu1 %v1717_v24 }
 0x2f5   : > { %v1990_v1 = vpop.permute.xlu0 %1989 }
 0x2fd   : > { %v1995_v49 = vpop.permute.xlu1 %1994 }
 0x301   : > { %v2000_v61 = vpop.permute.xlu1 %1999 }
 0x309   : > { %v2005_v11 = vpop.permute.xlu1 %2004 }
 0x373   : > { %v2354_v27 = vpop.f32.mrf.mxu0 }
 0x375   : > { %v2355_v3 = vpop.f32.mrf.mxu0 }
 0x376   : > { %v2356_v8 = vadd.f32 %v2355_v3, %v2354_v27 }
 0x377   : > { %v2357_v5 = vpop.f32.mrf.mxu0 }
 0x379   : > { %v2358_v7 = vpop.f32.mrf.mxu0 }
 0x37a   : > { %v2359_v9 = vadd.f32 %v2358_v7, %v2357_v5 }
 0x37b   : > { %v2360_v29 = vpop.f32.mrf.mxu0 }
 0x37c   : > { %v1944_v15 = vpack.c.bf16 %v2359_v9, %v2356_v8 }
 0x37d   : > { %v2361_v12 = vpop.f32.mrf.mxu0 }
 0x37e   : > { %v1960_v13 = vadd.bf16 %v3207_v25, %v1944_v15  ;;  %v2362_v18 = vadd.f32 %v2361_v12, %v2360_v29 }
 0x37f   : > { %v2363_v16 = vpop.f32.mrf.mxu0 }
 0x380   : > { %2591 = vtanh.bf16 %v1960_v13 }
 0x381   : > { %v2364_v17 = vpop.f32.mrf.mxu0 }
 0x382   : > { %v2365_v19 = vadd.f32 %v2364_v17, %v2363_v16 }
 0x383   : > { %v2366_v21 = vpop.f32.mrf.mxu0 }
 0x384   : > { %v1945_v22 = vpack.c.bf16 %v2365_v19, %v2362_v18 }
 0x385   : > { %v2367_v26 = vpop.f32.mrf.mxu0 }
 0x386   : > { %v1961_v6 = vadd.bf16 %v3207_v25, %v1945_v22  ;;  %v2368_v31 = vadd.f32 %v2367_v26, %v2366_v21 }
 0x387   : > { %v2369_v28 = vpop.f32.mrf.mxu0 }
 0x388   : > { %2593 = vtanh.bf16 %v1961_v6  ;;  %v2010_v6 = vpop.permute.xlu1 %2009 }
 0x389   : > { %v2370_v14 = vpop.f32.mrf.mxu0 }
 0x38a   : > { %v2371_v32 = vadd.f32 %v2370_v14, %v2369_v28 }
 0x38b   : > { %v2372_v34 = vpop.f32.mrf.mxu1 }
 0x38c   : > { %v1946_v37 = vpack.c.bf16 %v2371_v32, %v2368_v31 }
 0x38d   : > { %v2373_v33 = vpop.f32.mrf.mxu1 }
 0x38e   : > { %v2592_v35 = vpop.eup %2591  ;;  %v1962_v38 = vadd.bf16 %v3207_v25, %v1946_v37  ;;  %v2374_v43 = vadd.f32 %v2373_v33, %v2372_v34 }
 0x38f   : > { %v2034_v20 = vsel %vm3214_vm3, %v1990_v1, %v2592_v35  ;;  %v2375_v39 = vpop.f32.mrf.mxu1 }
 0x390   : > { %v2320_v40 = vcombine.low %v2034_v20, %v2034_v20  ;;  %v2321_v41 = vcombine.high %v2034_v20, %v2034_v20  ;;  %2595 = vtanh.bf16 %v1962_v38  ;;  %v2015_v38 = vpop.permute.xlu1 %2014 }
 0x391   : > { %v2376_v10 = vpop.f32.mrf.mxu1 }
 0x392   : > { %2098 = vst [vmem:[%s3224_s15] sm:$0xf] %v2320_v40  ;;  %2099 = vst [vmem:[%s3224_s15 + $0x4] sm:$0xf] %v2321_v41  ;;  %v2377_v44 = vadd.f32 %v2376_v10, %v2375_v39 }
 0x393   : > { %v2378_v45 = vpop.f32.mrf.mxu1 }
 0x394   : > { %v1947_v46 = vpack.c.bf16 %v2377_v44, %v2374_v43  ;;  %v2020_v43 = vpop.permute.xlu1 %2019 }
 0x395   : > { %v2379_v47 = vpop.f32.mrf.mxu1 }
 0x396   : > { %v2594_v48 = vpop.eup %2593  ;;  %v1963_v42 = vadd.bf16 %v3207_v25, %v1947_v46  ;;  %v2380_v55 = vadd.f32 %v2379_v47, %v2378_v45 }
 0x397   : > { %v2035_v50 = vsel %vm3214_vm3, %v1995_v49, %v2594_v48  ;;  %v2381_v51 = vpop.f32.mrf.mxu1 }
 0x398   : > { %v2322_v52 = vcombine.low %v2035_v50, %v2035_v50  ;;  %v2323_v53 = vcombine.high %v2035_v50, %v2035_v50  ;;  %2597 = vtanh.bf16 %v1963_v42  ;;  %v2025_v47 = vpop.permute.xlu1 %2024 }
 0x399   : > { %v2382_v54 = vpop.f32.mrf.mxu1 }
 0x39a   : > { %2100 = vst [vmem:[%s3224_s15 + $0x8] sm:$0xf] %v2322_v52  ;;  %2101 = vst [vmem:[%s3224_s15 + $0xc] sm:$0xf] %v2323_v53  ;;  %v2383_v56 = vadd.f32 %v2382_v54, %v2381_v51 }
 0x39b   : > { %v2384_v57 = vpop.f32.mrf.mxu1 }
 0x39c   : > { %v1948_v58 = vpack.c.bf16 %v2383_v56, %v2380_v55 }
 0x39d   : > { %v2385_v59 = vpop.f32.mrf.mxu1 }
 0x39e   : > { %v2596_v60 = vpop.eup %2595  ;;  %v1964_v62 = vadd.bf16 %v3207_v25, %v1948_v58  ;;  %v2386_v3 = vadd.f32 %v2385_v59, %v2384_v57 }
 0x39f   : > { %v2036_v63 = vsel %vm3214_vm3, %v2000_v61, %v2596_v60  ;;  %v2387_v0 = vpop.f32.mrf.mxu1 }
 0x3a0   : > { %v2324_v24 = vcombine.low %v2036_v63, %v2036_v63  ;;  %v2325_v27 = vcombine.high %v2036_v63, %v2036_v63  ;;  %2599 = vtanh.bf16 %v1964_v62 }
 0x3a1   : > { %v2388_v2 = vpop.f32.mrf.mxu1 }
 0x3a2   : > { %2102 = vst [vmem:[%s3224_s15 + $0x10] sm:$0xf] %v2324_v24  ;;  %2103 = vst [vmem:[%s3224_s15 + $0x14] sm:$0xf] %v2325_v27  ;;  %v2389_v4 = vadd.f32 %v2388_v2, %v2387_v0 }
 0x3a3   : > { %v2390_v5 = vpop.f32.mrf.mxu1 }
 0x3a4   : > { %v1949_v7 = vpack.c.bf16 %v2389_v4, %v2386_v3 }
 0x3a5   : > { %v2391_v8 = vpop.f32.mrf.mxu1 }
 0x3a6   : > { %v2598_v9 = vpop.eup %2597  ;;  %v1965_v29 = vadd.bf16 %v3207_v25, %v1949_v7  ;;  %v2392_v18 = vadd.f32 %v2391_v8, %v2390_v5 }
 0x3a7   : > { %v2037_v15 = vsel %vm3214_vm3, %v2005_v11, %v2598_v9  ;;  %v2393_v12 = vpop.f32.mrf.mxu1 }
 0x3a8   : > { %v2326_v13 = vcombine.low %v2037_v15, %v2037_v15  ;;  %v2327_v16 = vcombine.high %v2037_v15, %v2037_v15  ;;  %2601 = vtanh.bf16 %v1965_v29 }
 0x3a9   : > { %v2394_v17 = vpop.f32.mrf.mxu1 }
 0x3aa   : > { %2104 = vst [vmem:[%s3224_s15 + $0x18] sm:$0xf] %v2326_v13  ;;  %2105 = vst [vmem:[%s3224_s15 + $0x1c] sm:$0xf] %v2327_v16  ;;  %v2395_v19 = vadd.f32 %v2394_v17, %v2393_v12 }
 0x3ab   : > { %v2396_v21 = vpop.f32.mrf.mxu1 }
 0x3ac   : > { %v1950_v22 = vpack.c.bf16 %v2395_v19, %v2392_v18 }
 0x3ad   : > { %v2397_v23 = vpop.f32.mrf.mxu1 }
 0x3ae   : > { %v2600_v26 = vpop.eup %2599  ;;  %v1966_v28 = vadd.bf16 %v3207_v25, %v1950_v22  ;;  %v2398_v37 = vadd.f32 %v2397_v23, %v2396_v21 }
 0x3af   : > { %v2038_v30 = vsel %vm3214_vm3, %v2010_v6, %v2600_v26  ;;  %v2399_v14 = vpop.f32.mrf.mxu1 }
 0x3b0   : > { %v2328_v31 = vcombine.low %v2038_v30, %v2038_v30  ;;  %v2329_v32 = vcombine.high %v2038_v30, %v2038_v30  ;;  %2603 = vtanh.bf16 %v1966_v28 }
 0x3b1   : > { %v2400_v34 = vpop.f32.mrf.mxu1 }
 0x3b2   : > { %2106 = vst [vmem:[%s3224_s15 + $0x20] sm:$0xf] %v2328_v31  ;;  %2107 = vst [vmem:[%s3224_s15 + $0x24] sm:$0xf] %v2329_v32  ;;  %v2401_v33 = vadd.f32 %v2400_v34, %v2399_v14 }
 0x3b4   : > { %v1951_v35 = vpack.c.bf16 %v2401_v33, %v2398_v37 }
 0x3b6   : > { %v2602_v1 = vpop.eup %2601  ;;  %v1967_v20 = vadd.bf16 %v3207_v25, %v1951_v35 }
 0x3b7   : > { %v2039_v39 = vsel %vm3214_vm3, %v2015_v38, %v2602_v1 }
 0x3b8   : > { %v2330_v40 = vcombine.low %v2039_v39, %v2039_v39  ;;  %v2331_v41 = vcombine.high %v2039_v39, %v2039_v39  ;;  %2605 = vtanh.bf16 %v1967_v20 }
 0x3ba   : > { %2108 = vst [vmem:[%s3224_s15 + $0x28] sm:$0xf] %v2330_v40  ;;  %2109 = vst [vmem:[%s3224_s15 + $0x2c] sm:$0xf] %v2331_v41 }
 0x3be   : > { %v2604_v10 = vpop.eup %2603 }
 0x3bf   : > { %v2040_v44 = vsel %vm3214_vm3, %v2020_v43, %v2604_v10 }
 0x3c0   : > { %v2332_v45 = vcombine.low %v2040_v44, %v2040_v44  ;;  %v2333_v46 = vcombine.high %v2040_v44, %v2040_v44 }
 0x3c2   : > { %2110 = vst [vmem:[%s3224_s15 + $0x30] sm:$0xf] %v2332_v45  ;;  %2111 = vst [vmem:[%s3224_s15 + $0x34] sm:$0xf] %v2333_v46 }
 0x3c6   : > { %v2606_v25 = vpop.eup %2605 }
 0x3c7   : > { %v2041_v48 = vsel %vm3214_vm3, %v2025_v47, %v2606_v25 }
 0x3c8   : > { %v2334_v49 = vcombine.low %v2041_v48, %v2041_v48  ;;  %v2335_v42 = vcombine.high %v2041_v48, %v2041_v48 }
 0x3ca   : > { %2112 = vst [vmem:[%s3224_s15 + $0x38] sm:$0xf] %v2334_v49  ;;  %2113 = vst [vmem:[%s3224_s15 + $0x3c] sm:$0xf] %v2335_v42 }
 0x3cb PF: > { %s25_s19 = sadd.s32 1, %s2699_s19  }
 0x3cc   : > { %p22_p2 = scmp.ge.s32.totalorder %s25_s19, 4  }
 0x3ce   :  { %24 = sbr.rel (!%p22_p2) target bundleno = 5 (0x5), region = 107 }
 0x3d3   :  { %2136 = vsyncpa [#allocation4], 1 }
 0x3d4   :  { %2138 = vsyncpa [#allocation4 + $0x1], 1 }
 0x3d5   :  { %2139 = vsyncpa [#allocation6], 1 }

</bundles_post_ra>
